<compile_context>
chip_gen: v7x
topology: tpu7x:2x2x1
jax: 0.10.0
libtpu: 0.0.40
codegen_flags: <defaults>
</compile_context>

<pallas_src>
import jax
import jax.numpy as jnp
from jax import lax
from jax.experimental import pallas as pl
from jax.experimental.pallas import tpu as pltpu

_EPS = 1e-5
_NEG_HALF_MAX = -0.5 * float(jnp.finfo(jnp.float32).max)


def _round_up(a, b):
    return -(-a // b) * b


# --------------------- fused LayerNorm + matmul (norm1 + to_qkv) --------------

def _ln_matmul(x2d, gamma, beta, w_t, out_dtype=jnp.float32, block_rows=256):
    M, D = x2d.shape
    N = w_t.shape[1]
    tm = block_rows if M >= block_rows else _round_up(M, 8)
    Mp = _round_up(M, tm)
    if Mp != M:
        x2d = jnp.pad(x2d, ((0, Mp - M), (0, 0)))
    g2 = gamma.reshape(1, D).astype(jnp.float32)
    b2 = beta.reshape(1, D).astype(jnp.float32)

    def kernel(x_ref, g_ref, b_ref, w_ref, o_ref):
        x = x_ref[...]
        mu = jnp.mean(x, axis=-1, keepdims=True)
        xc = x - mu
        var = jnp.mean(xc * xc, axis=-1, keepdims=True)
        y = xc * lax.rsqrt(var + _EPS) * g_ref[...] + b_ref[...]
        o_ref[...] = jnp.dot(y, w_ref[...],
                             preferred_element_type=jnp.float32).astype(o_ref.dtype)

    out = pl.pallas_call(
        kernel,
        out_shape=jax.ShapeDtypeStruct((Mp, N), out_dtype),
        grid=(Mp // tm,),
        in_specs=[pl.BlockSpec((tm, D), lambda i: (i, 0)),
                  pl.BlockSpec((1, D), lambda i: (0, 0)),
                  pl.BlockSpec((1, D), lambda i: (0, 0)),
                  pl.BlockSpec((D, N), lambda i: (0, 0))],
        out_specs=pl.BlockSpec((tm, N), lambda i: (i, 0)),
        compiler_params=pltpu.CompilerParams(dimension_semantics=("parallel",)),
    )(x2d, g2, b2, w_t)
    return out[:M]


# --------------------- fused LayerNorm + FF + residual ------------------------

def _ln_ff(x2d, gamma, beta, w1_t, b1, w2_t, b2, block_rows=256):
    M, D = x2d.shape
    Dff = w1_t.shape[1]
    tm = block_rows if M >= block_rows else _round_up(M, 8)
    Mp = _round_up(M, tm)
    xp = jnp.pad(x2d, ((0, Mp - M), (0, 0))) if Mp != M else x2d
    gl = gamma.reshape(1, D).astype(jnp.float32)
    bl = beta.reshape(1, D).astype(jnp.float32)
    b1r = b1.reshape(1, Dff).astype(jnp.float32)
    b2r = b2.reshape(1, D).astype(jnp.float32)

    def kernel(x_ref, g_ref, bt_ref, w1_ref, b1_ref, w2_ref, b2_ref, o_ref):
        x = x_ref[...]
        mu = jnp.mean(x, axis=-1, keepdims=True)
        xc = x - mu
        var = jnp.mean(xc * xc, axis=-1, keepdims=True)
        y = xc * lax.rsqrt(var + _EPS) * g_ref[...] + bt_ref[...]
        h = jnp.dot(y, w1_ref[...], preferred_element_type=jnp.float32) + b1_ref[...]
        h = jnp.where(h >= 0, h, 0.01 * h)                       # LeakyReLU(0.01)
        z = jnp.dot(h, w2_ref[...], preferred_element_type=jnp.float32) + b2_ref[...]
        o_ref[...] = x + z                                       # second residual

    out = pl.pallas_call(
        kernel,
        out_shape=jax.ShapeDtypeStruct((Mp, D), jnp.float32),
        grid=(Mp // tm,),
        in_specs=[pl.BlockSpec((tm, D), lambda i: (i, 0)),
                  pl.BlockSpec((1, D), lambda i: (0, 0)),
                  pl.BlockSpec((1, D), lambda i: (0, 0)),
                  pl.BlockSpec((D, Dff), lambda i: (0, 0)),
                  pl.BlockSpec((1, Dff), lambda i: (0, 0)),
                  pl.BlockSpec((Dff, D), lambda i: (0, 0)),
                  pl.BlockSpec((1, D), lambda i: (0, 0))],
        out_specs=pl.BlockSpec((tm, D), lambda i: (i, 0)),
        compiler_params=pltpu.CompilerParams(dimension_semantics=("parallel",)),
    )(xp, gl, bl, w1_t, b1r, w2_t, b2r)
    return out[:M]


# --------------------- local windowed attention kernel ------------------------

def _make_attn_kernel(G, n_windows, nparts):
    def kernel(*refs):
        q_ref = refs[0]
        k_refs = refs[1:1 + nparts]
        v_refs = refs[1 + nparts:1 + 2 * nparts]
        (cq_ref, sq_ref, ck_ref, sk_ref,
         rot_ref, offs_ref, rel_ref) = refs[1 + 2 * nparts:8 + 2 * nparts]
        o_ref = refs[8 + 2 * nparts]

        g = pl.program_id(1)
        rot = rot_ref[...]                                       # (E, E) rotate_half matrix

        # rotary embedding in f32 (softmax scale folded into the q tables)
        q = q_ref[0, 0].astype(jnp.float32)                      # (G*ws, E)
        q_rot = (q * cq_ref[...] +
                 jnp.dot(q, rot, preferred_element_type=jnp.float32) * sq_ref[...])

        k = jnp.concatenate([r[0, 0].astype(jnp.float32) for r in k_refs], axis=0)  # (S, E)
        k_rot = (k * ck_ref[...] +
                 jnp.dot(k, rot, preferred_element_type=jnp.float32) * sk_ref[...])

        v = jnp.concatenate([r[0, 0] for r in v_refs], axis=0)   # (S, E) bf16

        # similarity on the MXU: bf16 operands, f32 accumulation
        sim = lax.dot_general(q_rot.astype(jnp.bfloat16), k_rot.astype(jnp.bfloat16),
                              (((1,), (1,)), ((), ())),
                              preferred_element_type=jnp.float32)  # (G*ws, S)

        # masks: grid-invariant relative bias (locality + causal, precomputed) plus a
        # cheap per-group boundary bias on a (1, S) vector (no in-kernel iota / idiv)
        wk = offs_ref[...] + g * G                                # (1, S) key window index
        bbias = jnp.where(jnp.logical_or(wk < 0, wk >= n_windows), _NEG_HALF_MAX, 0.0)
        sim = sim + rel_ref[...] + bbias

        # softmax in f32, normalize after the PV matmul (EUP reciprocal)
        m = jnp.max(sim, axis=-1, keepdims=True)
        p = jnp.exp(sim - m)
        l = jnp.sum(p, axis=-1, keepdims=True)
        out = jnp.dot(p.astype(jnp.bfloat16), v, preferred_element_type=jnp.float32)
        out = out * pl.reciprocal(l, approx=True)
        o_ref[0] = out.astype(o_ref.dtype)

    return kernel


def local_attention_pallas(qkv_h, E, ws, G, lb, lf, n_windows, causal):
    # qkv_h: (3, B*H, Lg, E) bf16, zero padded beyond the real sequence length
    _, BH, Lg, _ = qkv_h.shape
    Gw = G * ws
    n_groups = Lg // Gw
    S = (G + lb + lf) * ws
    half = E // 2
    scale = float(E) ** -0.5

    # rotate_half(x) == x @ rot  (constant +-1 matrix, passed in; the XLU roll
    # variant would free these tiny MXU ops, kept as a matmul for portability)
    rr = jnp.arange(E)[:, None]
    rc = jnp.arange(E)[None, :]
    rot = (jnp.where(rr == rc + half, -1.0, 0.0) +
           jnp.where(rr + half == rc, 1.0, 0.0)).astype(jnp.float32)

    # rotary tables on strip-local positions (relative-position equivalent to the
    # per-window tables lucidrains uses); softmax scale folded into the q tables
    inv_freq = 1.0 / (10000.0 ** (jnp.arange(0, E, 2, dtype=jnp.float32) / E))

    def rope_tables(pos, mult):
        f = pos[:, None] * inv_freq[None, :]
        f = jnp.concatenate([f, f], axis=-1)
        return ((jnp.cos(f) * mult).astype(jnp.float32),
                (jnp.sin(f) * mult).astype(jnp.float32))

    cos_k, sin_k = rope_tables(jnp.arange(S, dtype=jnp.float32), 1.0)
    cos_q, sin_q = rope_tables(jnp.arange(Gw, dtype=jnp.float32) + (lb + lf) * ws, scale)

    # per-strip-column window offset relative to g*G (precomputed)
    offs = (jnp.arange(S, dtype=jnp.int32) // ws - lb).reshape(1, S)

    # grid-invariant additive mask: look-back/forward locality (+ causal)
    qi = jnp.arange(Gw, dtype=jnp.int32)
    kj = jnp.arange(S, dtype=jnp.int32)
    cwin = qi // ws
    swin = kj // ws
    masked = (swin[None, :] < cwin[:, None]) | (swin[None, :] > cwin[:, None] + lb + lf)
    if causal:
        masked = masked | ((qi[:, None] + lb * ws) < kj[None, :])
    rel_bias = jnp.where(masked, _NEG_HALF_MAX, 0.0).astype(jnp.float32)

    nparts = 2 + (1 if lf else 0)
    last_blk = Lg // ws - 1

    def center_spec(sel):
        return pl.BlockSpec((1, 1, Gw, E), lambda b, g: (sel, b, g, 0))

    def prev_spec(sel):
        # g == 0: that window is out of range and fully masked -> clamp the fetch
        return pl.BlockSpec((1, 1, ws, E),
                            lambda b, g: (sel, b, jnp.maximum(g * G - 1, 0), 0))

    def next_spec(sel):
        # last group: that window is out of range and fully masked -> clamp the fetch
        return pl.BlockSpec((1, 1, ws, E),
                            lambda b, g: (sel, b, jnp.minimum((g + 1) * G, last_blk), 0))

    def const_spec(shape):
        return pl.BlockSpec(shape, lambda b, g: tuple(0 for _ in shape))

    in_specs = [center_spec(0), prev_spec(1), center_spec(1)]
    if lf:
        in_specs.append(next_spec(1))
    in_specs += [prev_spec(2), center_spec(2)]
    if lf:
        in_specs.append(next_spec(2))
    in_specs += [const_spec((Gw, E)), const_spec((Gw, E)),
                 const_spec((S, E)), const_spec((S, E)),
                 const_spec((E, E)), const_spec((1, S)), const_spec((Gw, S))]

    operands = [qkv_h] * (1 + 2 * nparts) + [cos_q, sin_q, cos_k, sin_k, rot, offs, rel_bias]

    return pl.pallas_call(
        _make_attn_kernel(G, n_windows, nparts),
        out_shape=jax.ShapeDtypeStruct((BH, Lg, E), jnp.float32),
        grid=(BH, n_groups),
        in_specs=in_specs,
        out_specs=pl.BlockSpec((1, Gw, E), lambda b, g: (b, g, 0)),
        compiler_params=pltpu.CompilerParams(
            dimension_semantics=("parallel", "parallel")),
    )(*operands)


# --------------------- full transformer block forward -------------------------

def lmha_transformer_block_forward(x, params, heads, window_size, causal):
    # TODO(synk): optional key-padding `mask` argument not implemented (module is run with mask=None)
    B, L0, D = x.shape
    H = heads
    E = D // H
    ws = window_size
    assert D % H == 0 and E % 2 == 0
    assert ws % 8 == 0, "window_size must be a multiple of 8 for TPU tiling"

    lb = 1
    lf = 0 if causal else 1
    G = max(1, -(-128 // ws))          # query windows per grid step (>=128 rows for the MXU)
    L = _round_up(L0, ws)              # lucidrains autopad length
    n_windows = L // ws
    n_groups = -(-n_windows // G)
    Lg = n_groups * G * ws

    # norm1 + QKV projection (fused, row-tiled, bf16 activation output)
    qkv = _ln_matmul(x.reshape(B * L0, D), params["ln1_g"], params["ln1_b"],
                     jnp.transpose(params["w_qkv"]), out_dtype=jnp.bfloat16)

    # (B*L0, 3D) -> (3, B*H, Lg, E): single relayout + autopad of the fused QKV tensor
    # TODO(synk): a head-major projection output would remove this transpose entirely.
    qkv_h = qkv.reshape(B, L0, 3, H, E).transpose(2, 0, 3, 1, 4).reshape(3, B * H, L0, E)
    qkv_h = jnp.pad(qkv_h, ((0, 0), (0, 0), (0, Lg - L0), (0, 0)))

    attn = local_attention_pallas(qkv_h, E, ws, G, lb, lf, n_windows, causal)
    attn = attn[:, :L0].reshape(B, H, L0, E).transpose(0, 2, 1, 3).reshape(B, L0, D)

    x1 = x + attn                      # dropout(p=0) == identity
    out = _ln_ff(x1.reshape(B * L0, D), params["ln2_g"], params["ln2_b"],
                 jnp.transpose(params["w1"]), params["b1"],
                 jnp.transpose(params["w2"]), params["b2"])
    return out.reshape(B, L0, D)


# --------------------- pure-JAX reference --------------------------------------

def _layernorm_ref(x, g, b):
    mu = x.mean(-1, keepdims=True)
    var = ((x - mu) ** 2).mean(-1, keepdims=True)
    return (x - mu) / jnp.sqrt(var + _EPS) * g + b


def local_mha_reference(x, w_qkv, heads, window_size, causal):
    B, L0, D = x.shape
    H = heads
    E = D // H
    ws = window_size
    lb = 1
    lf = 0 if causal else 1
    NL = lb + 1 + lf
    scale = E ** -0.5

    qkv = x @ w_qkv.T
    q, k, v = jnp.split(qkv, 3, axis=-1)

    def to_heads(t):
        return t.reshape(B, L0, H, E).transpose(0, 2, 1, 3).reshape(B * H, L0, E)
    q, k, v = to_heads(q), to_heads(k), to_heads(v)

    pad = (-L0) % ws
    L = L0 + pad
    if pad:
        q, k, v = (jnp.pad(t, ((0, 0), (0, pad), (0, 0))) for t in (q, k, v))
    W = L // ws
    BH = B * H

    bq = q.reshape(BH, W, ws, E) * scale
    bk = k.reshape(BH, W, ws, E)
    bv = v.reshape(BH, W, ws, E)

    def look_around(t, pad_value=0):
        pads = [(0, 0)] * t.ndim
        pads[1] = (lb, lf)
        tp = jnp.pad(t, pads, constant_values=pad_value)
        return jnp.concatenate([tp[:, i:i + W] for i in range(NL)], axis=2)

    bkl = look_around(bk)
    bvl = look_around(bv)

    nk = NL * ws
    inv_freq = 1.0 / (10000.0 ** (jnp.arange(0, E, 2, dtype=jnp.float32) / E))
    t_pos = jnp.arange(nk, dtype=jnp.float32)
    freqs = t_pos[:, None] * inv_freq[None, :]
    freqs = jnp.concatenate([freqs, freqs], axis=-1)
    cos_k, sin_k = jnp.cos(freqs), jnp.sin(freqs)
    cos_q, sin_q = cos_k[-ws:], sin_k[-ws:]

    def rot_half(t):
        return jnp.concatenate([-t[..., E // 2:], t[..., :E // 2]], axis=-1)

    bq_r = bq * cos_q + rot_half(bq) * sin_q
    bk_r = bkl * cos_k + rot_half(bkl) * sin_k

    b_t = jnp.arange(L).reshape(1, W, ws)
    bq_t = b_t[..., :, None]
    bq_k = look_around(b_t, pad_value=-1)[..., None, :]

    sim = jnp.einsum('bwie,bwje->bwij', bq_r, bk_r)
    mask_value = -float(jnp.finfo(jnp.float32).max)
    if causal:
        sim = jnp.where(bq_t < bq_k, mask_value, sim)
    sim = jnp.where(bq_k == -1, mask_value, sim)
    attn = jax.nn.softmax(sim, axis=-1)
    out = jnp.einsum('bwij,bwje->bwie', attn, bvl)
    out = out.reshape(BH, L, E)[:, :L0]
    return out.reshape(B, H, L0, E).transpose(0, 2, 1, 3).reshape(B, L0, D)


def block_reference(x, params, heads, window_size, causal):
    attn = local_mha_reference(_layernorm_ref(x, params["ln1_g"], params["ln1_b"]),
                               params["w_qkv"], heads, window_size, causal)
    x1 = x + attn
    y = _layernorm_ref(x1, params["ln2_g"], params["ln2_b"])
    h = y @ params["w1"].T + params["b1"]
    h = jnp.where(h >= 0, h, 0.01 * h)
    return x1 + h @ params["w2"].T + params["b2"]


# --------------------- demo -----------------------------------------------------

if __name__ == "__main__":
    key = jax.random.PRNGKey(0)
    ks = jax.random.split(key, 10)
    B, L, D = 2, 40, 32            # L not a multiple of window_size -> exercises autopad
    heads, window_size, dim_ff = 2, 16, 64

    x = jax.random.normal(ks[0], (B, L, D), dtype=jnp.float32)
    bd = 1.0 / (D ** 0.5)
    bf = 1.0 / (dim_ff ** 0.5)
    params = dict(
        w_qkv=jax.random.uniform(ks[1], (3 * D, D), minval=-bd, maxval=bd, dtype=jnp.float32),
        ln1_g=1.0 + 0.1 * jax.random.normal(ks[2], (D,), dtype=jnp.float32),
        ln1_b=0.1 * jax.random.normal(ks[3], (D,), dtype=jnp.float32),
        ln2_g=1.0 + 0.1 * jax.random.normal(ks[4], (D,), dtype=jnp.float32),
        ln2_b=0.1 * jax.random.normal(ks[5], (D,), dtype=jnp.float32),
        w1=jax.random.uniform(ks[6], (dim_ff, D), minval=-bd, maxval=bd, dtype=jnp.float32),
        b1=jax.random.uniform(ks[7], (dim_ff,), minval=-bd, maxval=bd, dtype=jnp.float32),
        w2=jax.random.uniform(ks[8], (D, dim_ff), minval=-bf, maxval=bf, dtype=jnp.float32),
        b2=jax.random.uniform(ks[9], (D,), minval=-bf, maxval=bf, dtype=jnp.float32),
    )

    fwd = jax.jit(lmha_transformer_block_forward, static_argnums=(2, 3, 4))

    for causal in (True, False):
        out = jax.block_until_ready(fwd(x, params, heads, window_size, causal))
        assert out.shape == (B, L, D)
        assert bool(jnp.all(jnp.isfinite(out)))
        ref = block_reference(x, params, heads, window_size, causal)
        err = float(jnp.max(jnp.abs(out - ref)))
        assert bool(jnp.allclose(out, ref, rtol=2e-2, atol=2e-2)), (causal, err)

    print("KERNEL_OK")
</pallas_src>

<mosaic_0001>
module attributes {stable_mosaic.version = 11 : i64} {
  func.func @kernel(%arg0: i32, %arg1: memref<80x32xf32, #tpu.memory_space<vmem>>, %arg2: memref<1x32xf32, #tpu.memory_space<vmem>>, %arg3: memref<1x32xf32, #tpu.memory_space<vmem>>, %arg4: memref<32x96xf32, #tpu.memory_space<vmem>>, %arg5: memref<80x96xbf16, #tpu.memory_space<vmem>>) attributes {dimension_semantics = [#tpu.dimension_semantics<parallel>], iteration_bounds = array<i64: 1>, scalar_prefetch = 0 : i64, scratch_operands = 0 : i64, tpu.core_type = #tpu.core_type<tc>, window_params = [{transform_indices = @transform_0, window_bounds = array<i64: 80, 32>}, {pipeline_mode = #tpu.pipeline_mode<synchronous>, transform_indices = @transform_1, window_bounds = array<i64: 1, 32>}, {pipeline_mode = #tpu.pipeline_mode<synchronous>, transform_indices = @transform_2, window_bounds = array<i64: 1, 32>}, {pipeline_mode = #tpu.pipeline_mode<synchronous>, transform_indices = @transform_3, window_bounds = array<i64: 32, 96>}, {transform_indices = @transform_4, window_bounds = array<i64: 80, 96>}]} {
    %c0 = arith.constant 0 : index
    %c0_0 = arith.constant 0 : index
    %0 = vector.load %arg1[%c0, %c0_0] : memref<80x32xf32, #tpu.memory_space<vmem>>, vector<80x32xf32>
    %cst = arith.constant dense<0.000000e+00> : vector<80xf32>
    %1 = vector.multi_reduction <add>, %0, %cst [1] : vector<80x32xf32> to vector<80xf32>
    %2 = vector.shape_cast %1 : vector<80xf32> to vector<80x1xf32>
    %cst_1 = arith.constant 3.200000e+01 : f32
    %3 = vector.broadcast %cst_1 : f32 to vector<80x1xf32>
    %4 = arith.divf %2, %3 : vector<80x1xf32>
    %5 = vector.broadcast %4 : vector<80x1xf32> to vector<80x32xf32>
    %6 = arith.subf %0, %5 : vector<80x32xf32>
    %7 = arith.mulf %6, %6 : vector<80x32xf32>
    %cst_2 = arith.constant dense<0.000000e+00> : vector<80xf32>
    %8 = vector.multi_reduction <add>, %7, %cst_2 [1] : vector<80x32xf32> to vector<80xf32>
    %9 = vector.shape_cast %8 : vector<80xf32> to vector<80x1xf32>
    %cst_3 = arith.constant 3.200000e+01 : f32
    %10 = vector.broadcast %cst_3 : f32 to vector<80x1xf32>
    %11 = arith.divf %9, %10 : vector<80x1xf32>
    %cst_4 = arith.constant 9.99999974E-6 : f32
    %12 = vector.broadcast %cst_4 : f32 to vector<80x1xf32>
    %13 = arith.addf %11, %12 : vector<80x1xf32>
    %14 = math.rsqrt %13 : vector<80x1xf32>
    %15 = vector.broadcast %14 : vector<80x1xf32> to vector<80x32xf32>
    %16 = arith.mulf %6, %15 : vector<80x32xf32>
    %c0_5 = arith.constant 0 : index
    %c0_6 = arith.constant 0 : index
    %17 = vector.load %arg2[%c0_5, %c0_6] : memref<1x32xf32, #tpu.memory_space<vmem>>, vector<1x32xf32>
    %18 = vector.broadcast %17 : vector<1x32xf32> to vector<80x32xf32>
    %19 = arith.mulf %16, %18 : vector<80x32xf32>
    %c0_7 = arith.constant 0 : index
    %c0_8 = arith.constant 0 : index
    %20 = vector.load %arg3[%c0_7, %c0_8] : memref<1x32xf32, #tpu.memory_space<vmem>>, vector<1x32xf32>
    %21 = vector.broadcast %20 : vector<1x32xf32> to vector<80x32xf32>
    %22 = arith.addf %19, %21 : vector<80x32xf32>
    %c0_9 = arith.constant 0 : index
    %c0_10 = arith.constant 0 : index
    %23 = vector.load %arg4[%c0_9, %c0_10] : memref<32x96xf32, #tpu.memory_space<vmem>>, vector<32x96xf32>
    %cst_11 = arith.constant dense<0.000000e+00> : vector<80x96xf32>
    %24 = tpu.matmul %22, %23, %cst_11 {dimension_numbers = #tpu.dot_dimension_numbers<[1], [0], [0], [1], [0, 0, 1, 1], [], []>} : vector<80x32xf32>, vector<32x96xf32>, vector<80x96xf32> -> vector<80x96xf32>
    %25 = arith.truncf %24 : vector<80x96xf32> to vector<80x96xbf16>
    %c0_12 = arith.constant 0 : index
    %c0_13 = arith.constant 0 : index
    %26 = vector.load %arg5[%c0_12, %c0_13] : memref<80x96xbf16, #tpu.memory_space<vmem>>, vector<80x96xbf16>
    tpu.vector_store %arg5[%c0_12, %c0_13], %25 {strides = array<i32>} : memref<80x96xbf16, #tpu.memory_space<vmem>>, vector<80x96xbf16>,
    return
  }
  func.func @transform_0(%arg0: i32) -> (i32, i32) {
    %c0_i32 = arith.constant 0 : i32
    %c0_i32_0 = arith.constant 0 : i32
    return %arg0, %c0_i32 : i32, i32
  }
  func.func @transform_1(%arg0: i32) -> (i32, i32) {
    %c0_i32 = arith.constant 0 : i32
    %c0_i32_0 = arith.constant 0 : i32
    %c0_i32_1 = arith.constant 0 : i32
    return %c0_i32, %c0_i32_0 : i32, i32
  }
  func.func @transform_2(%arg0: i32) -> (i32, i32) {
    %c0_i32 = arith.constant 0 : i32
    %c0_i32_0 = arith.constant 0 : i32
    %c0_i32_1 = arith.constant 0 : i32
    return %c0_i32, %c0_i32_0 : i32, i32
  }
  func.func @transform_3(%arg0: i32) -> (i32, i32) {
    %c0_i32 = arith.constant 0 : i32
    %c0_i32_0 = arith.constant 0 : i32
    %c0_i32_1 = arith.constant 0 : i32
    return %c0_i32, %c0_i32_0 : i32, i32
  }
  func.func @transform_4(%arg0: i32) -> (i32, i32) {
    %c0_i32 = arith.constant 0 : i32
    %c0_i32_0 = arith.constant 0 : i32
    return %arg0, %c0_i32 : i32, i32
  }
}

module attributes {stable_mosaic.version = 11 : i64} {
  func.func @kernel(%arg0: i32, %arg1: i32, %arg2: memref<1x1x128x16xbf16, #tpu.memory_space<vmem>>, %arg3: memref<1x1x16x16xbf16, #tpu.memory_space<vmem>>, %arg4: memref<1x1x128x16xbf16, #tpu.memory_space<vmem>>, %arg5: memref<1x1x16x16xbf16, #tpu.memory_space<vmem>>, %arg6: memref<1x1x128x16xbf16, #tpu.memory_space<vmem>>, %arg7: memref<128x16xf32, #tpu.memory_space<vmem>>, %arg8: memref<128x16xf32, #tpu.memory_space<vmem>>, %arg9: memref<144x16xf32, #tpu.memory_space<vmem>>, %arg10: memref<144x16xf32, #tpu.memory_space<vmem>>, %arg11: memref<16x16xf32, #tpu.memory_space<vmem>>, %arg12: memref<1x144xi32, #tpu.memory_space<vmem>>, %arg13: memref<128x144xf32, #tpu.memory_space<vmem>>, %arg14: memref<1x128x16xf32, #tpu.memory_space<vmem>>) attributes {dimension_semantics = [#tpu.dimension_semantics<parallel>, #tpu.dimension_semantics<parallel>], iteration_bounds = array<i64: 4, 1>, scalar_prefetch = 0 : i64, scratch_operands = 0 : i64, tpu.core_type = #tpu.core_type<tc>, window_params = [{transform_indices = @transform_0, window_bounds = array<i64: 1, 1, 128, 16>}, {transform_indices = @transform_1, window_bounds = array<i64: 1, 1, 16, 16>}, {transform_indices = @transform_2, window_bounds = array<i64: 1, 1, 128, 16>}, {transform_indices = @transform_3, window_bounds = array<i64: 1, 1, 16, 16>}, {transform_indices = @transform_4, window_bounds = array<i64: 1, 1, 128, 16>}, {pipeline_mode = #tpu.pipeline_mode<synchronous>, transform_indices = @transform_5, window_bounds = array<i64: 128, 16>}, {pipeline_mode = #tpu.pipeline_mode<synchronous>, transform_indices = @transform_6, window_bounds = array<i64: 128, 16>}, {pipeline_mode = #tpu.pipeline_mode<synchronous>, transform_indices = @transform_7, window_bounds = array<i64: 144, 16>}, {pipeline_mode = #tpu.pipeline_mode<synchronous>, transform_indices = @transform_8, window_bounds = array<i64: 144, 16>}, {pipeline_mode = #tpu.pipeline_mode<synchronous>, transform_indices = @transform_9, window_bounds = array<i64: 16, 16>}, {pipeline_mode = #tpu.pipeline_mode<synchronous>, transform_indices = @transform_10, window_bounds = array<i64: 1, 144>}, {pipeline_mode = #tpu.pipeline_mode<synchronous>, transform_indices = @transform_11, window_bounds = array<i64: 128, 144>}, {transform_indices = @transform_12, window_bounds = array<i64: 1, 128, 16>}]} {
    %c0 = arith.constant 0 : index
    %c0_0 = arith.constant 0 : index
    %0 = vector.load %arg11[%c0, %c0_0] : memref<16x16xf32, #tpu.memory_space<vmem>>, vector<16x16xf32>
    %c0_1 = arith.constant 0 : index
    %c0_2 = arith.constant 0 : index
    %c0_3 = arith.constant 0 : index
    %c0_4 = arith.constant 0 : index
    %1 = vector.load %arg2[%c0_1, %c0_2, %c0_3, %c0_4] : memref<1x1x128x16xbf16, #tpu.memory_space<vmem>>, vector<1x1x128x16xbf16>
    %2 = vector.shape_cast %1 : vector<1x1x128x16xbf16> to vector<128x16xbf16>
    %3 = arith.extf %2 : vector<128x16xbf16> to vector<128x16xf32>
    %c0_5 = arith.constant 0 : index
    %c0_6 = arith.constant 0 : index
    %4 = vector.load %arg7[%c0_5, %c0_6] : memref<128x16xf32, #tpu.memory_space<vmem>>, vector<128x16xf32>
    %5 = arith.mulf %3, %4 : vector<128x16xf32>
    %cst = arith.constant dense<0.000000e+00> : vector<128x16xf32>
    %6 = tpu.matmul %3, %0, %cst {dimension_numbers = #tpu.dot_dimension_numbers<[1], [0], [0], [1], [0, 0, 1, 1], [], []>} : vector<128x16xf32>, vector<16x16xf32>, vector<128x16xf32> -> vector<128x16xf32>
    %c0_7 = arith.constant 0 : index
    %c0_8 = arith.constant 0 : index
    %7 = vector.load %arg8[%c0_7, %c0_8] : memref<128x16xf32, #tpu.memory_space<vmem>>, vector<128x16xf32>
    %8 = arith.mulf %6, %7 : vector<128x16xf32>
    %9 = arith.addf %5, %8 : vector<128x16xf32>
    %c0_9 = arith.constant 0 : index
    %c0_10 = arith.constant 0 : index
    %c0_11 = arith.constant 0 : index
    %c0_12 = arith.constant 0 : index
    %10 = vector.load %arg3[%c0_9, %c0_10, %c0_11, %c0_12] : memref<1x1x16x16xbf16, #tpu.memory_space<vmem>>, vector<1x1x16x16xbf16>
    %11 = vector.shape_cast %10 : vector<1x1x16x16xbf16> to vector<16x16xbf16>
    %12 = arith.extf %11 : vector<16x16xbf16> to vector<16x16xf32>
    %c0_13 = arith.constant 0 : index
    %c0_14 = arith.constant 0 : index
    %c0_15 = arith.constant 0 : index
    %c0_16 = arith.constant 0 : index
    %13 = vector.load %arg4[%c0_13, %c0_14, %c0_15, %c0_16] : memref<1x1x128x16xbf16, #tpu.memory_space<vmem>>, vector<1x1x128x16xbf16>
    %14 = vector.shape_cast %13 : vector<1x1x128x16xbf16> to vector<128x16xbf16>
    %15 = arith.extf %14 : vector<128x16xbf16> to vector<128x16xf32>
    %16 = tpu.concatenate %12, %15 in 0 : vector<16x16xf32>, vector<128x16xf32> -> vector<144x16xf32>
    %c0_17 = arith.constant 0 : index
    %c0_18 = arith.constant 0 : index
    %17 = vector.load %arg9[%c0_17, %c0_18] : memref<144x16xf32, #tpu.memory_space<vmem>>, vector<144x16xf32>
    %18 = arith.mulf %16, %17 : vector<144x16xf32>
    %cst_19 = arith.constant dense<0.000000e+00> : vector<144x16xf32>
    %19 = tpu.matmul %16, %0, %cst_19 {dimension_numbers = #tpu.dot_dimension_numbers<[1], [0], [0], [1], [0, 0, 1, 1], [], []>} : vector<144x16xf32>, vector<16x16xf32>, vector<144x16xf32> -> vector<144x16xf32>
    %c0_20 = arith.constant 0 : index
    %c0_21 = arith.constant 0 : index
    %20 = vector.load %arg10[%c0_20, %c0_21] : memref<144x16xf32, #tpu.memory_space<vmem>>, vector<144x16xf32>
    %21 = arith.mulf %19, %20 : vector<144x16xf32>
    %22 = arith.addf %18, %21 : vector<144x16xf32>
    %c0_22 = arith.constant 0 : index
    %c0_23 = arith.constant 0 : index
    %c0_24 = arith.constant 0 : index
    %c0_25 = arith.constant 0 : index
    %23 = vector.load %arg5[%c0_22, %c0_23, %c0_24, %c0_25] : memref<1x1x16x16xbf16, #tpu.memory_space<vmem>>, vector<1x1x16x16xbf16>
    %24 = vector.shape_cast %23 : vector<1x1x16x16xbf16> to vector<16x16xbf16>
    %c0_26 = arith.constant 0 : index
    %c0_27 = arith.constant 0 : index
    %c0_28 = arith.constant 0 : index
    %c0_29 = arith.constant 0 : index
    %25 = vector.load %arg6[%c0_26, %c0_27, %c0_28, %c0_29] : memref<1x1x128x16xbf16, #tpu.memory_space<vmem>>, vector<1x1x128x16xbf16>
    %26 = vector.shape_cast %25 : vector<1x1x128x16xbf16> to vector<128x16xbf16>
    %27 = tpu.concatenate %24, %26 in 0 : vector<16x16xbf16>, vector<128x16xbf16> -> vector<144x16xbf16>
    %28 = arith.truncf %9 : vector<128x16xf32> to vector<128x16xbf16>
    %29 = arith.truncf %22 : vector<144x16xf32> to vector<144x16xbf16>
    %cst_30 = arith.constant dense<0.000000e+00> : vector<128x144xf32>
    %30 = tpu.matmul %28, %29, %cst_30 {dimension_numbers = #tpu.dot_dimension_numbers<[1], [1], [0], [0], [0, 0, 1, 0], [], []>} : vector<128x16xbf16>, vector<144x16xbf16>, vector<128x144xf32> -> vector<128x144xf32>
    %c0_31 = arith.constant 0 : index
    %c0_32 = arith.constant 0 : index
    %31 = vector.load %arg12[%c0_31, %c0_32] : memref<1x144xi32, #tpu.memory_space<vmem>>, vector<1x144xi32>
    %c8_i32 = arith.constant 8 : i32
    %32 = arith.muli %arg1, %c8_i32 : i32
    %33 = vector.broadcast %32 : i32 to vector<1x144xi32>
    %34 = arith.addi %31, %33 : vector<1x144xi32>
    %c0_i32 = arith.constant 0 : i32
    %35 = vector.broadcast %c0_i32 : i32 to vector<1x144xi32>
    %36 = arith.cmpi slt, %34, %35 : vector<1x144xi32>
    %c3_i32 = arith.constant 3 : i32
    %37 = vector.broadcast %c3_i32 : i32 to vector<1x144xi32>
    %38 = arith.cmpi sge, %34, %37 : vector<1x144xi32>
    %39 = arith.ori %36, %38 : vector<1x144xi1>
    %cst_33 = arith.constant -1.70141173E+38 : f32
    %cst_34 = arith.constant 0.000000e+00 : f32
    %40 = vector.broadcast %cst_33 : f32 to vector<1x144xf32>
    %41 = vector.broadcast %cst_34 : f32 to vector<1x144xf32>
    %42 = arith.select %39, %40, %41 : vector<1x144xi1>, vector<1x144xf32>
    %c0_35 = arith.constant 0 : index
    %c0_36 = arith.constant 0 : index
    %43 = vector.load %arg13[%c0_35, %c0_36] : memref<128x144xf32, #tpu.memory_space<vmem>>, vector<128x144xf32>
    %44 = arith.addf %30, %43 : vector<128x144xf32>
    %45 = vector.broadcast %42 : vector<1x144xf32> to vector<128x144xf32>
    %46 = arith.addf %44, %45 : vector<128x144xf32>
    %cst_37 = arith.constant dense<0xFF800000> : vector<128xf32>
    %47 = vector.multi_reduction <maximumf>, %46, %cst_37 [1] : vector<128x144xf32> to vector<128xf32>
    %48 = vector.shape_cast %47 : vector<128xf32> to vector<128x1xf32>
    %49 = vector.broadcast %48 : vector<128x1xf32> to vector<128x144xf32>
    %50 = arith.subf %46, %49 : vector<128x144xf32>
    %51 = math.exp %50 : vector<128x144xf32>
    %cst_38 = arith.constant dense<0.000000e+00> : vector<128xf32>
    %52 = vector.multi_reduction <add>, %51, %cst_38 [1] : vector<128x144xf32> to vector<128xf32>
    %53 = vector.shape_cast %52 : vector<128xf32> to vector<128x1xf32>
    %54 = arith.truncf %51 : vector<128x144xf32> to vector<128x144xbf16>
    %cst_39 = arith.constant dense<0.000000e+00> : vector<128x16xf32>
    %55 = tpu.matmul %54, %27, %cst_39 {dimension_numbers = #tpu.dot_dimension_numbers<[1], [0], [0], [1], [0, 0, 1, 1], [], []>} : vector<128x144xbf16>, vector<144x16xbf16>, vector<128x16xf32> -> vector<128x16xf32>
    %56 = tpu.reciprocal %53 {approx = true} : vector<128x1xf32> -> vector<128x1xf32>
    %57 = vector.broadcast %56 : vector<128x1xf32> to vector<128x16xf32>
    %58 = arith.mulf %55, %57 : vector<128x16xf32>
    %c0_40 = arith.constant 0 : index
    %c0_41 = arith.constant 0 : index
    %c0_42 = arith.constant 0 : index
    %59 = vector.load %arg14[%c0_40, %c0_41, %c0_42] : memref<1x128x16xf32, #tpu.memory_space<vmem>>, vector<1x128x16xf32>
    %60 = vector.shape_cast %59 : vector<1x128x16xf32> to vector<128x16xf32>
    %61 = vector.shape_cast %58 : vector<128x16xf32> to vector<1x128x16xf32>
    tpu.vector_store %arg14[%c0_40, %c0_41, %c0_42], %61 {strides = array<i32>} : memref<1x128x16xf32, #tpu.memory_space<vmem>>, vector<1x128x16xf32>,
    return
  }
  func.func @transform_0(%arg0: i32, %arg1: i32) -> (i32, i32, i32, i32) {
    %c0_i32 = arith.constant 0 : i32
    %c0_i32_0 = arith.constant 0 : i32
    %c0_i32_1 = arith.constant 0 : i32
    return %c0_i32, %arg0, %arg1, %c0_i32_0 : i32, i32, i32, i32
  }
  func.func @transform_1(%arg0: i32, %arg1: i32) -> (i32, i32, i32, i32) {
    %c8_i32 = arith.constant 8 : i32
    %0 = arith.muli %arg1, %c8_i32 : i32
    %c1_i32 = arith.constant 1 : i32
    %1 = arith.subi %0, %c1_i32 : i32
    %c0_i32 = arith.constant 0 : i32
    %2 = arith.maxsi %1, %c0_i32 : i32
    %c1_i32_0 = arith.constant 1 : i32
    %c0_i32_1 = arith.constant 0 : i32
    %c0_i32_2 = arith.constant 0 : i32
    return %c1_i32_0, %arg0, %2, %c0_i32_1 : i32, i32, i32, i32
  }
  func.func @transform_2(%arg0: i32, %arg1: i32) -> (i32, i32, i32, i32) {
    %c1_i32 = arith.constant 1 : i32
    %c0_i32 = arith.constant 0 : i32
    %c0_i32_0 = arith.constant 0 : i32
    return %c1_i32, %arg0, %arg1, %c0_i32 : i32, i32, i32, i32
  }
  func.func @transform_3(%arg0: i32, %arg1: i32) -> (i32, i32, i32, i32) {
    %c8_i32 = arith.constant 8 : i32
    %0 = arith.muli %arg1, %c8_i32 : i32
    %c1_i32 = arith.constant 1 : i32
    %1 = arith.subi %0, %c1_i32 : i32
    %c0_i32 = arith.constant 0 : i32
    %2 = arith.maxsi %1, %c0_i32 : i32
    %c2_i32 = arith.constant 2 : i32
    %c0_i32_0 = arith.constant 0 : i32
    %c0_i32_1 = arith.constant 0 : i32
    return %c2_i32, %arg0, %2, %c0_i32_0 : i32, i32, i32, i32
  }
  func.func @transform_4(%arg0: i32, %arg1: i32) -> (i32, i32, i32, i32) {
    %c2_i32 = arith.constant 2 : i32
    %c0_i32 = arith.constant 0 : i32
    %c0_i32_0 = arith.constant 0 : i32
    return %c2_i32, %arg0, %arg1, %c0_i32 : i32, i32, i32, i32
  }
  func.func @transform_5(%arg0: i32, %arg1: i32) -> (i32, i32) {
    %c0_i32 = arith.constant 0 : i32
    %c0_i32_0 = arith.constant 0 : i32
    %c0_i32_1 = arith.constant 0 : i32
    return %c0_i32, %c0_i32_0 : i32, i32
  }
  func.func @transform_6(%arg0: i32, %arg1: i32) -> (i32, i32) {
    %c0_i32 = arith.constant 0 : i32
    %c0_i32_0 = arith.constant 0 : i32
    %c0_i32_1 = arith.constant 0 : i32
    return %c0_i32, %c0_i32_0 : i32, i32
  }
  func.func @transform_7(%arg0: i32, %arg1: i32) -> (i32, i32) {
    %c0_i32 = arith.constant 0 : i32
    %c0_i32_0 = arith.constant 0 : i32
    %c0_i32_1 = arith.constant 0 : i32
    return %c0_i32, %c0_i32_0 : i32, i32
  }
  func.func @transform_8(%arg0: i32, %arg1: i32) -> (i32, i32) {
    %c0_i32 = arith.constant 0 : i32
    %c0_i32_0 = arith.constant 0 : i32
    %c0_i32_1 = arith.constant 0 : i32
    return %c0_i32, %c0_i32_0 : i32, i32
  }
  func.func @transform_9(%arg0: i32, %arg1: i32) -> (i32, i32) {
    %c0_i32 = arith.constant 0 : i32
    %c0_i32_0 = arith.constant 0 : i32
    %c0_i32_1 = arith.constant 0 : i32
    return %c0_i32, %c0_i32_0 : i32, i32
  }
  func.func @transform_10(%arg0: i32, %arg1: i32) -> (i32, i32) {
    %c0_i32 = arith.constant 0 : i32
    %c0_i32_0 = arith.constant 0 : i32
    %c0_i32_1 = arith.constant 0 : i32
    return %c0_i32, %c0_i32_0 : i32, i32
  }
  func.func @transform_11(%arg0: i32, %arg1: i32) -> (i32, i32) {
    %c0_i32 = arith.constant 0 : i32
    %c0_i32_0 = arith.constant 0 : i32
    %c0_i32_1 = arith.constant 0 : i32
    return %c0_i32, %c0_i32_0 : i32, i32
  }
  func.func @transform_12(%arg0: i32, %arg1: i32) -> (i32, i32, i32) {
    %c0_i32 = arith.constant 0 : i32
    %c0_i32_0 = arith.constant 0 : i32
    return %arg0, %arg1, %c0_i32 : i32, i32, i32
  }
}

module attributes {stable_mosaic.version = 11 : i64} {
  func.func @kernel(%arg0: i32, %arg1: memref<80x32xf32, #tpu.memory_space<vmem>>, %arg2: memref<1x32xf32, #tpu.memory_space<vmem>>, %arg3: memref<1x32xf32, #tpu.memory_space<vmem>>, %arg4: memref<32x64xf32, #tpu.memory_space<vmem>>, %arg5: memref<1x64xf32, #tpu.memory_space<vmem>>, %arg6: memref<64x32xf32, #tpu.memory_space<vmem>>, %arg7: memref<1x32xf32, #tpu.memory_space<vmem>>, %arg8: memref<80x32xf32, #tpu.memory_space<vmem>>) attributes {dimension_semantics = [#tpu.dimension_semantics<parallel>], iteration_bounds = array<i64: 1>, scalar_prefetch = 0 : i64, scratch_operands = 0 : i64, tpu.core_type = #tpu.core_type<tc>, window_params = [{transform_indices = @transform_0, window_bounds = array<i64: 80, 32>}, {pipeline_mode = #tpu.pipeline_mode<synchronous>, transform_indices = @transform_1, window_bounds = array<i64: 1, 32>}, {pipeline_mode = #tpu.pipeline_mode<synchronous>, transform_indices = @transform_2, window_bounds = array<i64: 1, 32>}, {pipeline_mode = #tpu.pipeline_mode<synchronous>, transform_indices = @transform_3, window_bounds = array<i64: 32, 64>}, {pipeline_mode = #tpu.pipeline_mode<synchronous>, transform_indices = @transform_4, window_bounds = array<i64: 1, 64>}, {pipeline_mode = #tpu.pipeline_mode<synchronous>, transform_indices = @transform_5, window_bounds = array<i64: 64, 32>}, {pipeline_mode = #tpu.pipeline_mode<synchronous>, transform_indices = @transform_6, window_bounds = array<i64: 1, 32>}, {transform_indices = @transform_7, window_bounds = array<i64: 80, 32>}]} {
    %c0 = arith.constant 0 : index
    %c0_0 = arith.constant 0 : index
    %0 = vector.load %arg1[%c0, %c0_0] : memref<80x32xf32, #tpu.memory_space<vmem>>, vector<80x32xf32>
    %cst = arith.constant dense<0.000000e+00> : vector<80xf32>
    %1 = vector.multi_reduction <add>, %0, %cst [1] : vector<80x32xf32> to vector<80xf32>
    %2 = vector.shape_cast %1 : vector<80xf32> to vector<80x1xf32>
    %cst_1 = arith.constant 3.200000e+01 : f32
    %3 = vector.broadcast %cst_1 : f32 to vector<80x1xf32>
    %4 = arith.divf %2, %3 : vector<80x1xf32>
    %5 = vector.broadcast %4 : vector<80x1xf32> to vector<80x32xf32>
    %6 = arith.subf %0, %5 : vector<80x32xf32>
    %7 = arith.mulf %6, %6 : vector<80x32xf32>
    %cst_2 = arith.constant dense<0.000000e+00> : vector<80xf32>
    %8 = vector.multi_reduction <add>, %7, %cst_2 [1] : vector<80x32xf32> to vector<80xf32>
    %9 = vector.shape_cast %8 : vector<80xf32> to vector<80x1xf32>
    %cst_3 = arith.constant 3.200000e+01 : f32
    %10 = vector.broadcast %cst_3 : f32 to vector<80x1xf32>
    %11 = arith.divf %9, %10 : vector<80x1xf32>
    %cst_4 = arith.constant 9.99999974E-6 : f32
    %12 = vector.broadcast %cst_4 : f32 to vector<80x1xf32>
    %13 = arith.addf %11, %12 : vector<80x1xf32>
    %14 = math.rsqrt %13 : vector<80x1xf32>
    %15 = vector.broadcast %14 : vector<80x1xf32> to vector<80x32xf32>
    %16 = arith.mulf %6, %15 : vector<80x32xf32>
    %c0_5 = arith.constant 0 : index
    %c0_6 = arith.constant 0 : index
    %17 = vector.load %arg2[%c0_5, %c0_6] : memref<1x32xf32, #tpu.memory_space<vmem>>, vector<1x32xf32>
    %18 = vector.broadcast %17 : vector<1x32xf32> to vector<80x32xf32>
    %19 = arith.mulf %16, %18 : vector<80x32xf32>
    %c0_7 = arith.constant 0 : index
    %c0_8 = arith.constant 0 : index
    %20 = vector.load %arg3[%c0_7, %c0_8] : memref<1x32xf32, #tpu.memory_space<vmem>>, vector<1x32xf32>
    %21 = vector.broadcast %20 : vector<1x32xf32> to vector<80x32xf32>
    %22 = arith.addf %19, %21 : vector<80x32xf32>
    %c0_9 = arith.constant 0 : index
    %c0_10 = arith.constant 0 : index
    %23 = vector.load %arg4[%c0_9, %c0_10] : memref<32x64xf32, #tpu.memory_space<vmem>>, vector<32x64xf32>
    %cst_11 = arith.constant dense<0.000000e+00> : vector<80x64xf32>
    %24 = tpu.matmul %22, %23, %cst_11 {dimension_numbers = #tpu.dot_dimension_numbers<[1], [0], [0], [1], [0, 0, 1, 1], [], []>} : vector<80x32xf32>, vector<32x64xf32>, vector<80x64xf32> -> vector<80x64xf32>
    %c0_12 = arith.constant 0 : index
    %c0_13 = arith.constant 0 : index
    %25 = vector.load %arg5[%c0_12, %c0_13] : memref<1x64xf32, #tpu.memory_space<vmem>>, vector<1x64xf32>
    %26 = vector.broadcast %25 : vector<1x64xf32> to vector<80x64xf32>
    %27 = arith.addf %24, %26 : vector<80x64xf32>
    %cst_14 = arith.constant 0.000000e+00 : f32
    %28 = vector.broadcast %cst_14 : f32 to vector<80x64xf32>
    %29 = arith.cmpf oge, %27, %28 : vector<80x64xf32>
    %cst_15 = arith.constant 0.00999999977 : f32
    %30 = vector.broadcast %cst_15 : f32 to vector<80x64xf32>
    %31 = arith.mulf %30, %27 : vector<80x64xf32>
    %32 = arith.select %29, %27, %31 : vector<80x64xi1>, vector<80x64xf32>
    %c0_16 = arith.constant 0 : index
    %c0_17 = arith.constant 0 : index
    %33 = vector.load %arg6[%c0_16, %c0_17] : memref<64x32xf32, #tpu.memory_space<vmem>>, vector<64x32xf32>
    %cst_18 = arith.constant dense<0.000000e+00> : vector<80x32xf32>
    %34 = tpu.matmul %32, %33, %cst_18 {dimension_numbers = #tpu.dot_dimension_numbers<[1], [0], [0], [1], [0, 0, 1, 1], [], []>} : vector<80x64xf32>, vector<64x32xf32>, vector<80x32xf32> -> vector<80x32xf32>
    %c0_19 = arith.constant 0 : index
    %c0_20 = arith.constant 0 : index
    %35 = vector.load %arg7[%c0_19, %c0_20] : memref<1x32xf32, #tpu.memory_space<vmem>>, vector<1x32xf32>
    %36 = vector.broadcast %35 : vector<1x32xf32> to vector<80x32xf32>
    %37 = arith.addf %34, %36 : vector<80x32xf32>
    %38 = arith.addf %0, %37 : vector<80x32xf32>
    %c0_21 = arith.constant 0 : index
    %c0_22 = arith.constant 0 : index
    %39 = vector.load %arg8[%c0_21, %c0_22] : memref<80x32xf32, #tpu.memory_space<vmem>>, vector<80x32xf32>
    tpu.vector_store %arg8[%c0_21, %c0_22], %38 {strides = array<i32>} : memref<80x32xf32, #tpu.memory_space<vmem>>, vector<80x32xf32>,
    return
  }
  func.func @transform_0(%arg0: i32) -> (i32, i32) {
    %c0_i32 = arith.constant 0 : i32
    %c0_i32_0 = arith.constant 0 : i32
    return %arg0, %c0_i32 : i32, i32
  }
  func.func @transform_1(%arg0: i32) -> (i32, i32) {
    %c0_i32 = arith.constant 0 : i32
    %c0_i32_0 = arith.constant 0 : i32
    %c0_i32_1 = arith.constant 0 : i32
    return %c0_i32, %c0_i32_0 : i32, i32
  }
  func.func @transform_2(%arg0: i32) -> (i32, i32) {
    %c0_i32 = arith.constant 0 : i32
    %c0_i32_0 = arith.constant 0 : i32
    %c0_i32_1 = arith.constant 0 : i32
    return %c0_i32, %c0_i32_0 : i32, i32
  }
  func.func @transform_3(%arg0: i32) -> (i32, i32) {
    %c0_i32 = arith.constant 0 : i32
    %c0_i32_0 = arith.constant 0 : i32
    %c0_i32_1 = arith.constant 0 : i32
    return %c0_i32, %c0_i32_0 : i32, i32
  }
  func.func @transform_4(%arg0: i32) -> (i32, i32) {
    %c0_i32 = arith.constant 0 : i32
    %c0_i32_0 = arith.constant 0 : i32
    %c0_i32_1 = arith.constant 0 : i32
    return %c0_i32, %c0_i32_0 : i32, i32
  }
  func.func @transform_5(%arg0: i32) -> (i32, i32) {
    %c0_i32 = arith.constant 0 : i32
    %c0_i32_0 = arith.constant 0 : i32
    %c0_i32_1 = arith.constant 0 : i32
    return %c0_i32, %c0_i32_0 : i32, i32
  }
  func.func @transform_6(%arg0: i32) -> (i32, i32) {
    %c0_i32 = arith.constant 0 : i32
    %c0_i32_0 = arith.constant 0 : i32
    %c0_i32_1 = arith.constant 0 : i32
    return %c0_i32, %c0_i32_0 : i32, i32
  }
  func.func @transform_7(%arg0: i32) -> (i32, i32) {
    %c0_i32 = arith.constant 0 : i32
    %c0_i32_0 = arith.constant 0 : i32
    return %arg0, %c0_i32 : i32, i32
  }
}

</mosaic_0001>

<bundles_post_ra>
// kernel: lmha_transformer_block_forward.3
= control target key start
LH: loop header
LB: loop body
LE: loop exit
PB: predicated region body
PF: predicated region fallthrough
CT: control target
= control target key end

     0   :  { %vm27_vm0 = vcmask 261120   ;;  %vm382_vm1 = vcmask 781312   ;;  %s691_s0 = inlined_call_operand.vmem [shape: f32[80,32], index: 0, kind: input, shape index: {}]   ;;  %s692_s3 = inlined_call_operand.vmem [shape: f32[32,96], index: 3, kind: input, shape index: {}]   ;;  %s693_s1 = inlined_call_operand.vmem [shape: f32[1,32], index: 1, kind: input, shape index: {}]   ;;  %s694_s2 = inlined_call_operand.vmem [shape: f32[1,32], index: 2, kind: input, shape index: {}]   ;;  %s695_s4 = inlined_call_operand.vmem [shape: bf16[80,96], index: 4, kind: output, shape index: {}]  }
   0x1   :  { %v17_v0 = vld [vmem:[%s691_s0] sm:$0xff]  ;;  %v19_v1 = vld [vmem:[%s691_s0 + $0x10] sm:$0xff]  ;;  %v18_v2 = vld [vmem:[%s691_s0 + $0x8] sm:$0xff] }
   0x2   :  { %v28_v3 = vsel %vm27_vm0, %v17_v0, 0.0  ;;  %v34_v4 = vsel %vm27_vm0, %v19_v1, 0.0  ;;  %v23_v5 = vld [vmem:[%s691_s0 + $0x30] sm:$0xff]  ;;  %v31_v6 = vsel %vm27_vm0, %v18_v2, 0.0  ;;  %v20_v8 = vld [vmem:[%s691_s0 + $0x18] sm:$0xff]  ;;  %v21_v12 = vld [vmem:[%s691_s0 + $0x20] sm:$0xff] }
   0x3   :  { %29 = vadd.xlane.f32.xlu0 %v28_v3  ;;  %35 = vadd.xlane.f32.xlu1 %v34_v4  ;;  %v46_v7 = vsel %vm27_vm0, %v23_v5, 0.0  ;;  %v24_v9 = vld [vmem:[%s691_s0 + $0x38] sm:$0xff]  ;;  %v37_v10 = vsel %vm27_vm0, %v20_v8, 0.0  ;;  %v25_v13 = vld [vmem:[%s691_s0 + $0x40] sm:$0xff]  ;;  %v40_v14 = vsel %vm27_vm0, %v21_v12, 0.0  ;;  %v22_v16 = vld [vmem:[%s691_s0 + $0x28] sm:$0xff] }
   0x4   :  { %v49_v11 = vsel %vm27_vm0, %v24_v9, 0.0  ;;  %v52_v15 = vsel %vm27_vm0, %v25_v13, 0.0  ;;  %v26_v17 = vld [vmem:[%s691_s0 + $0x48] sm:$0xff]  ;;  %v43_v18 = vsel %vm27_vm0, %v22_v16, 0.0 }
   0x5   :  { %v55_v19 = vsel %vm27_vm0, %v26_v17, 0.0 }
   0x7   :  { %32 = vadd.xlane.f32.xlu0 %v31_v6  ;;  %47 = vadd.xlane.f32.xlu1 %v46_v7  ;;  %v193_v6 = vld [vmem:[%s692_s3] sm:$0xff]  ;;  %v194_v7 = vld [vmem:[%s692_s3 + $0x8] sm:$0xff] }
   0xb   :  { %38 = vadd.xlane.f32.xlu0 %v37_v10  ;;  %50 = vadd.xlane.f32.xlu1 %v49_v11  ;;  %v196_v10 = vld [vmem:[%s692_s3 + $0x18] sm:$0xff] }
   0xf   :  { %41 = vadd.xlane.f32.xlu0 %v40_v14  ;;  %53 = vadd.xlane.f32.xlu1 %v52_v15 }
  0x13   :  { %44 = vadd.xlane.f32.xlu0 %v43_v18  ;;  %56 = vadd.xlane.f32.xlu1 %v55_v19 }
  0x90   :  { %v30_v20 = vpop.xlane.xlu0 %29  ;;  %v36_v21 = vpop.xlane.xlu1 %35 }
  0x91   :  { %v59_v22 = vmul.f32 0.03125, %v30_v20  ;;  %v61_v23 = vmul.f32 0.03125, %v36_v21 }
  0x93   :  { %v563_v24 = vsub.f32 %v17_v0, %v59_v22  ;;  %v565_v25 = vsub.f32 %v19_v1, %v61_v23 }
  0x94   :  { %v33_v26 = vpop.xlane.xlu0 %32  ;;  %v48_v27 = vpop.xlane.xlu1 %47 }
  0x95   :  { %v60_v28 = vmul.f32 0.03125, %v33_v26  ;;  %v65_v29 = vmul.f32 0.03125, %v48_v27  ;;  %v79_v30 = vmul.f32 %v563_v24, %v563_v24  ;;  %v81_v31 = vmul.f32 %v565_v25, %v565_v25 }
  0x97   :  { %v571_v32 = vsub.f32 %v18_v2, %v60_v28  ;;  %v573_v33 = vsub.f32 %v23_v5, %v65_v29  ;;  %v89_v34 = vsel %vm27_vm0, %v79_v30, 0.0  ;;  %v95_v37 = vsel %vm27_vm0, %v81_v31, 0.0 }
  0x98   :  { %90 = vadd.xlane.f32.xlu0 %v89_v34  ;;  %v39_v35 = vpop.xlane.xlu0 %38  ;;  %v51_v36 = vpop.xlane.xlu1 %50 }
  0x99   :  { %v62_v38 = vmul.f32 0.03125, %v39_v35  ;;  %v66_v39 = vmul.f32 0.03125, %v51_v36  ;;  %v80_v40 = vmul.f32 %v571_v32, %v571_v32  ;;  %v85_v41 = vmul.f32 %v573_v33, %v573_v33 }
  0x9b   :  { %v581_v42 = vsub.f32 %v20_v8, %v62_v38  ;;  %v583_v43 = vsub.f32 %v24_v9, %v66_v39  ;;  %v92_v44 = vsel %vm27_vm0, %v80_v40, 0.0  ;;  %v107_v47 = vsel %vm27_vm0, %v85_v41, 0.0  ;;  %v195_v9 = vld [vmem:[%s692_s3 + $0x10] sm:$0xff]  ;;  %v397_v38 = vld [vmem:[%s693_s1] ss:$0 sm:$0xff] }
  0x9c   :  { %96 = vadd.xlane.f32.xlu0 %v95_v37  ;;  %93 = vadd.xlane.f32.xlu1 %v92_v44  ;;  %v42_v45 = vpop.xlane.xlu0 %41  ;;  %v54_v46 = vpop.xlane.xlu1 %53  ;;  %v466_v8 = vpack.c.bf16 %v194_v7, %v193_v6  ;;  %v470_v11 = vpack.c.bf16 %v196_v10, %v195_v9 }
  0x9d   :  { %v63_v48 = vmul.f32 0.03125, %v42_v45  ;;  %v67_v49 = vmul.f32 0.03125, %v54_v46  ;;  %v82_v50 = vmul.f32 %v581_v42, %v581_v42  ;;  %v86_v51 = vmul.f32 %v583_v43, %v583_v43  ;;  %v398_v46 = vld [vmem:[%s694_s2] ss:$0 sm:$0xff] }
  0x9e   :  { %467 = vmatprep.subr.bf16.mxu0 %v466_v8  ;;  %474 = vmatprep.subr.bf16.mxu1 %v466_v8 }
  0x9f   :  { %v591_v52 = vsub.f32 %v21_v12, %v63_v48  ;;  %v593_v53 = vsub.f32 %v25_v13, %v67_v49  ;;  %v98_v54 = vsel %vm27_vm0, %v82_v50, 0.0  ;;  %v110_v57 = vsel %vm27_vm0, %v86_v51, 0.0  ;;  %469 = vmatpush3.bf16.msra.mxu0 %v466_v8  ;;  %476 = vmatpush3.bf16.msra.mxu1 %v466_v8 }
  0xa0   :  { %108 = vadd.xlane.f32.xlu1 %v107_v47  ;;  %99 = vadd.xlane.f32.xlu0 %v98_v54  ;;  %v45_v55 = vpop.xlane.xlu0 %44  ;;  %v57_v56 = vpop.xlane.xlu1 %56 }
  0xa1   :  { %v64_v58 = vmul.f32 0.03125, %v45_v55  ;;  %v68_v59 = vmul.f32 0.03125, %v57_v56  ;;  %v83_v60 = vmul.f32 %v591_v52, %v591_v52  ;;  %v87_v61 = vmul.f32 %v593_v53, %v593_v53  ;;  %471 = vmatprep.subr.bf16.mxu0 %v470_v11  ;;  %475 = vmatprep.subr.bf16.mxu1 %v470_v11 }
  0xa3   :  { %v601_v62 = vsub.f32 %v22_v16, %v64_v58  ;;  %v603_v63 = vsub.f32 %v26_v17, %v68_v59  ;;  %v101_v0 = vsel %vm27_vm0, %v83_v60, 0.0  ;;  %v113_v1 = vsel %vm27_vm0, %v87_v61, 0.0  ;;  %473 = vmatpush3.bf16.msra.mxu0 %v470_v11  ;;  %477 = vmatpush3.bf16.msra.mxu1 %v470_v11 }
  0xa4   :  { %111 = vadd.xlane.f32.xlu1 %v110_v57  ;;  %102 = vadd.xlane.f32.xlu0 %v101_v0 }
  0xa5   :  { %v84_v2 = vmul.f32 %v601_v62, %v601_v62  ;;  %v88_v3 = vmul.f32 %v603_v63, %v603_v63 }
  0xa7   :  { %v104_v4 = vsel %vm27_vm0, %v84_v2, 0.0  ;;  %v116_v5 = vsel %vm27_vm0, %v88_v3, 0.0 }
  0xa8   :  { %114 = vadd.xlane.f32.xlu1 %v113_v1  ;;  %105 = vadd.xlane.f32.xlu0 %v104_v4 }
  0xac   :  { %117 = vadd.xlane.f32.xlu1 %v116_v5 }
 0x125   :  { %v91_v12 = vpop.xlane.xlu0 %90 }
 0x126   :  { %v119_v13 = vmul.f32 0.03125, %v91_v12 }
 0x128   :  { %v129_v14 = vadd.f32 1e-05, %v119_v13 }
 0x129   :  { %v94_v15 = vpop.xlane.xlu1 %93  ;;  %v97_v16 = vpop.xlane.xlu0 %96 }
 0x12a   :  { %478 = vrsqrt.f32 %v129_v14  ;;  %v120_v17 = vmul.f32 0.03125, %v94_v15  ;;  %v121_v18 = vmul.f32 0.03125, %v97_v16 }
 0x12c   :  { %v130_v19 = vadd.f32 1e-05, %v120_v17  ;;  %v131_v20 = vadd.f32 1e-05, %v121_v18 }
 0x12d   :  { %v109_v21 = vpop.xlane.xlu1 %108  ;;  %v100_v22 = vpop.xlane.xlu0 %99 }
 0x12e   :  { %480 = vrsqrt.f32 %v130_v19  ;;  %v125_v23 = vmul.f32 0.03125, %v109_v21  ;;  %v122_v26 = vmul.f32 0.03125, %v100_v22 }
 0x12f   :  { %482 = vrsqrt.f32 %v131_v20 }
 0x130   :  { %v135_v27 = vadd.f32 1e-05, %v125_v23  ;;  %v132_v28 = vadd.f32 1e-05, %v122_v26 }
 0x131   :  { %v112_v29 = vpop.xlane.xlu1 %111  ;;  %v103_v30 = vpop.xlane.xlu0 %102 }
 0x132   :  { %484 = vrsqrt.f32 %v135_v27  ;;  %v126_v31 = vmul.f32 0.03125, %v112_v29  ;;  %v123_v34 = vmul.f32 0.03125, %v103_v30 }
 0x133   :  { %486 = vrsqrt.f32 %v132_v28 }
 0x134   :  { %v479_v35 = vpop.eup %478  ;;  %v136_v36 = vadd.f32 1e-05, %v126_v31  ;;  %v133_v37 = vadd.f32 1e-05, %v123_v34 }
 0x135   :  { %v115_v39 = vpop.xlane.xlu1 %114  ;;  %v106_v40 = vpop.xlane.xlu0 %105  ;;  %v149_v41 = vmul.f32 %v479_v35, %v563_v24 }
 0x136   :  { %488 = vrsqrt.f32 %v136_v36  ;;  %v127_v44 = vmul.f32 0.03125, %v115_v39  ;;  %v124_v45 = vmul.f32 0.03125, %v106_v40 }
 0x137   :  { %490 = vrsqrt.f32 %v133_v37  ;;  %v166_v47 = vmul.f32 %v397_v38, %v149_v41 }
 0x138   :  { %v481_v48 = vpop.eup %480  ;;  %v137_v49 = vadd.f32 1e-05, %v127_v44  ;;  %v134_v50 = vadd.f32 1e-05, %v124_v45 }
 0x139   :  { %v483_v51 = vpop.eup %482  ;;  %v118_v54 = vpop.xlane.xlu1 %117  ;;  %v183_v55 = vadd.f32 %v398_v46, %v166_v47  ;;  %v150_v56 = vmul.f32 %v481_v48, %v571_v32 }
 0x13a   :  { %492 = vrsqrt.f32 %v137_v49  ;;  %v128_v57 = vmul.f32 0.03125, %v118_v54  ;;  %v151_v24 = vmul.f32 %v483_v51, %v565_v25 }
 0x13b   :  { %494 = vrsqrt.f32 %v134_v50  ;;  %451 = vmatprep.mubr.msk.f32.mxu0 %vm27_vm0, %v183_v55  ;;  %v167_v58 = vmul.f32 %v397_v38, %v150_v56 }
 0x13c   :  { %v485_v59 = vpop.eup %484  ;;  %v138_v60 = vadd.f32 1e-05, %v128_v57  ;;  %v168_v61 = vmul.f32 %v397_v38, %v151_v24 }
 0x13d   :  { %v487_v0 = vpop.eup %486  ;;  %v184_v1 = vadd.f32 %v398_v46, %v167_v58  ;;  %v155_v2 = vmul.f32 %v485_v59, %v573_v33 }
 0x13e   :  { %496 = vrsqrt.f32 %v138_v60  ;;  %v185_v3 = vadd.f32 %v398_v46, %v168_v61  ;;  %v152_v4 = vmul.f32 %v487_v0, %v581_v42 }
 0x13f   :  { %452 = vmatmul.mubr.msk.f32.vlgmr.msra.gmra.mrb[0].mxu0 %vm27_vm0, %v184_v1  ;;  %v172_v32 = vmul.f32 %v397_v38, %v155_v2 }
 0x140   :  { %v489_v5 = vpop.eup %488  ;;  %454 = vmatprep.mubr.msk.f32.mxu0 %vm27_vm0, %v185_v3  ;;  %v169_v25 = vmul.f32 %v397_v38, %v152_v4 }
 0x141   :  { %v491_v6 = vpop.eup %490  ;;  %v189_v7 = vadd.f32 %v398_v46, %v172_v32  ;;  %v156_v8 = vmul.f32 %v489_v5, %v583_v43 }
 0x142   :  { %v186_v9 = vadd.f32 %v398_v46, %v169_v25  ;;  %v153_v10 = vmul.f32 %v491_v6, %v591_v52 }
 0x143   :  { %460 = vmatprep.mubr.msk.f32.mxu1 %vm27_vm0, %v189_v7  ;;  %v173_v33 = vmul.f32 %v397_v38, %v156_v8 }
 0x144   :  { %v493_v11 = vpop.eup %492  ;;  %455 = vmatmul.mubr.msk.f32.gmra.mrb[2].mxu0 %vm27_vm0, %v186_v9  ;;  %v170_v42 = vmul.f32 %v397_v38, %v153_v10 }
 0x145   :  { %v495_v12 = vpop.eup %494  ;;  %v190_v13 = vadd.f32 %v398_v46, %v173_v33  ;;  %v157_v14 = vmul.f32 %v493_v11, %v593_v53 }
 0x146   :  { %v187_v15 = vadd.f32 %v398_v46, %v170_v42  ;;  %v154_v16 = vmul.f32 %v495_v12, %v601_v62 }
 0x147   :  { %461 = vmatmul.mubr.msk.f32.vlgmr.msra.gmra.mrb[0].mxu1 %vm27_vm0, %v190_v13  ;;  %v174_v43 = vmul.f32 %v397_v38, %v157_v14 }
 0x148   :  { %v497_v17 = vpop.eup %496  ;;  %457 = vmatprep.mubr.msk.f32.mxu0 %vm27_vm0, %v187_v15  ;;  %v171_v52 = vmul.f32 %v397_v38, %v154_v16 }
 0x149   :  { %v191_v18 = vadd.f32 %v398_v46, %v174_v43  ;;  %v158_v19 = vmul.f32 %v497_v17, %v603_v63 }
 0x14a   :  { %v188_v20 = vadd.f32 %v398_v46, %v171_v52 }
 0x14b   :  { %463 = vmatprep.mubr.msk.f32.mxu1 %vm27_vm0, %v191_v18  ;;  %v175_v21 = vmul.f32 %v397_v38, %v158_v19 }
 0x14c   :  { %458 = vmatmul.mubr.msk.f32.gmra.mrb[4].mxu0 %vm27_vm0, %v188_v20 }
 0x14d   :  { %v192_v53 = vadd.f32 %v398_v46, %v175_v21 }
 0x14f   :  { %464 = vmatmul.mubr.msk.f32.gmra.mrb[2].mxu1 %vm27_vm0, %v192_v53 }
 0x212   :  { %v453_v62 = vpop.f32.mrb[0].mxu0 }
 0x213   :  { %v420_v22 = vpack.c.bf16 %v453_v62, %v453_v62  ;;  %v293_v23 = vpop.f32.mrb[1].mxu0 }
 0x214   :  { %v419_v26 = vpack.c.bf16 %v293_v23, %v293_v23 }
 0x215   :  { %384 = vst.msk [vmem:[%s695_s4 + $0x4] sm:$0xf] %vm382_vm1, %v420_v22 }
 0x216   :  { %383 = vst.msk [vmem:[%s695_s4] sm:$0xf] %vm382_vm1, %v419_v26 }
 0x217   :  { %v456_v63 = vpop.f32.mrb[2].mxu0 }
 0x218   :  { %v422_v27 = vpack.c.bf16 %v456_v63, %v456_v63  ;;  %v303_v28 = vpop.f32.mrb[3].mxu0 }
 0x219   :  { %v421_v29 = vpack.c.bf16 %v303_v28, %v303_v28 }
 0x21a   :  { %386 = vst.msk [vmem:[%s695_s4 + $0xc] sm:$0xf] %vm382_vm1, %v422_v27  ;;  %v462_v30 = vpop.f32.mrb[0].mxu1 }
 0x21b   :  { %385 = vst.msk [vmem:[%s695_s4 + $0x8] sm:$0xf] %vm382_vm1, %v421_v29  ;;  %v426_v31 = vpack.c.bf16 %v462_v30, %v462_v30  ;;  %v323_v34 = vpop.f32.mrb[1].mxu1 }
 0x21c   :  { %v425_v35 = vpack.c.bf16 %v323_v34, %v323_v34 }
 0x21d   :  { %390 = vst.msk [vmem:[%s695_s4 + $0x1c] sm:$0xf] %vm382_vm1, %v426_v31 }
 0x21e   :  { %389 = vst.msk [vmem:[%s695_s4 + $0x18] sm:$0xf] %vm382_vm1, %v425_v35 }
 0x21f   :  { %v459_v36 = vpop.f32.mrb[4].mxu0 }
 0x220   :  { %v424_v37 = vpack.c.bf16 %v459_v36, %v459_v36  ;;  %v313_v38 = vpop.f32.mrb[5].mxu0 }
 0x221   :  { %v423_v39 = vpack.c.bf16 %v313_v38, %v313_v38 }
 0x222   :  { %388 = vst.msk [vmem:[%s695_s4 + $0x14] sm:$0xf] %vm382_vm1, %v424_v37  ;;  %v465_v40 = vpop.f32.mrb[2].mxu1 }
 0x223   :  { %387 = vst.msk [vmem:[%s695_s4 + $0x10] sm:$0xf] %vm382_vm1, %v423_v39  ;;  %v428_v41 = vpack.c.bf16 %v465_v40, %v465_v40  ;;  %v333_v44 = vpop.f32.mrb[3].mxu1 }
 0x224   :  { %v427_v45 = vpack.c.bf16 %v333_v44, %v333_v44 }
 0x225   :  { %392 = vst.msk [vmem:[%s695_s4 + $0x24] sm:$0xf] %vm382_vm1, %v428_v41 }
 0x226   :  { %391 = vst.msk [vmem:[%s695_s4 + $0x20] sm:$0xf] %vm382_vm1, %v427_v45 }

// kernel: lmha_transformer_block_forward.5
= control target key start
LH: loop header
LB: loop body
LE: loop exit
PB: predicated region body
PF: predicated region fallthrough
CT: control target
= control target key end

     0   :  { %vm36_vm0 = vcmask 261120   ;;  %vm403_vm3 = vcmask 523264   ;;  %s1057_s0 = inlined_call_operand.vmem [shape: f32[80,32], index: 0, kind: input, shape index: {}]   ;;  %s1058_s3 = inlined_call_operand.vmem [shape: f32[32,64], index: 3, kind: input, shape index: {}]   ;;  %s1059_s5 = inlined_call_operand.vmem [shape: f32[64,32], index: 5, kind: input, shape index: {}]   ;;  %s1060_s1 = inlined_call_operand.vmem [shape: f32[1,32], index: 1, kind: input, shape index: {}]   ;;  %s1061_s2 = inlined_call_operand.vmem [shape: f32[1,32], index: 2, kind: input, shape index: {}]   ;;  %s1062_s4 = inlined_call_operand.vmem [shape: f32[1,64], index: 4, kind: input, shape index: {}]   ;;  %s1063_s6 = inlined_call_operand.vmem [shape: f32[1,32], index: 6, kind: input, shape index: {}]   ;;  %s1064_s7 = inlined_call_operand.vmem [shape: f32[80,32], index: 7, kind: output, shape index: {}]  }
   0x1   :  { %v778_v0 = vld [vmem:[%s1057_s0] sm:$0xff]  ;;  %v783_v1 = vld [vmem:[%s1057_s0 + $0x10] sm:$0xff]  ;;  %v788_v2 = vld [vmem:[%s1057_s0 + $0x8] sm:$0xff] }
   0x2   :  { %v37_v3 = vsel %vm36_vm0, %v778_v0, 0.0  ;;  %v43_v4 = vsel %vm36_vm0, %v783_v1, 0.0  ;;  %v797_v5 = vld [vmem:[%s1057_s0 + $0x18] sm:$0xff]  ;;  %v40_v6 = vsel %vm36_vm0, %v788_v2, 0.0  ;;  %v806_v8 = vld [vmem:[%s1057_s0 + $0x20] sm:$0xff]  ;;  %v811_v9 = vld [vmem:[%s1057_s0 + $0x28] sm:$0xff] }
   0x3   :  { %38 = vadd.xlane.f32.xlu0 %v37_v3  ;;  %44 = vadd.xlane.f32.xlu1 %v43_v4  ;;  %v46_v7 = vsel %vm36_vm0, %v797_v5, 0.0  ;;  %v49_v10 = vsel %vm36_vm0, %v806_v8, 0.0  ;;  %v52_v11 = vsel %vm36_vm0, %v811_v9, 0.0  ;;  %v820_v12 = vld [vmem:[%s1057_s0 + $0x30] sm:$0xff]  ;;  %v825_v13 = vld [vmem:[%s1057_s0 + $0x38] sm:$0xff]  ;;  %v834_v16 = vld [vmem:[%s1057_s0 + $0x40] sm:$0xff] }
   0x4   :  { %v55_v14 = vsel %vm36_vm0, %v820_v12, 0.0  ;;  %v58_v15 = vsel %vm36_vm0, %v825_v13, 0.0  ;;  %v839_v17 = vld [vmem:[%s1057_s0 + $0x48] sm:$0xff]  ;;  %v61_v18 = vsel %vm36_vm0, %v834_v16, 0.0 }
   0x5   :  { %v64_v19 = vsel %vm36_vm0, %v839_v17, 0.0 }
   0x7   :  { %41 = vadd.xlane.f32.xlu0 %v40_v6  ;;  %47 = vadd.xlane.f32.xlu1 %v46_v7 }
   0xb   :  { %50 = vadd.xlane.f32.xlu0 %v49_v10  ;;  %53 = vadd.xlane.f32.xlu1 %v52_v11 }
   0xf   :  { %56 = vadd.xlane.f32.xlu0 %v55_v14  ;;  %59 = vadd.xlane.f32.xlu1 %v58_v15  ;;  %v202_v14 = vld [vmem:[%s1058_s3] sm:$0xff]  ;;  %v203_v15 = vld [vmem:[%s1058_s3 + $0x8] sm:$0xff] }
  0x13   :  { %62 = vadd.xlane.f32.xlu0 %v61_v18  ;;  %65 = vadd.xlane.f32.xlu1 %v64_v19  ;;  %v683_v18 = vpack.c.bf16 %v203_v15, %v202_v14  ;;  %v204_v19 = vld [vmem:[%s1058_s3 + $0x10] sm:$0xff] }
  0x15   :  { %684 = vmatprep.subr.bf16.mxu0 %v683_v18 }
  0x16   :  { %686 = vmatpush3.bf16.msra.mxu0 %v683_v18 }
  0x90   :  { %v39_v20 = vpop.xlane.xlu0 %38  ;;  %v45_v21 = vpop.xlane.xlu1 %44 }
  0x91   :  { %v68_v22 = vmul.f32 0.03125, %v39_v20  ;;  %v70_v23 = vmul.f32 0.03125, %v45_v21  ;;  %v205_v20 = vld [vmem:[%s1058_s3 + $0x18] sm:$0xff] }
  0x92   :  { %v687_v21 = vpack.c.bf16 %v205_v20, %v204_v19 }
  0x93   :  { %v846_v24 = vsub.f32 %v778_v0, %v68_v22  ;;  %v849_v25 = vsub.f32 %v783_v1, %v70_v23  ;;  %v388_v22 = vld [vmem:[%s1059_s5] sm:$0xff]  ;;  %v389_v23 = vld [vmem:[%s1059_s5 + $0x8] sm:$0xff] }
  0x94   :  { %v42_v26 = vpop.xlane.xlu0 %41  ;;  %v48_v27 = vpop.xlane.xlu1 %47  ;;  %688 = vmatprep.subr.bf16.mxu0 %v687_v21 }
  0x95   :  { %v69_v28 = vmul.f32 0.03125, %v42_v26  ;;  %v71_v29 = vmul.f32 0.03125, %v48_v27  ;;  %v88_v30 = vmul.f32 %v846_v24, %v846_v24  ;;  %v90_v31 = vmul.f32 %v849_v25, %v849_v25  ;;  %690 = vmatpush3.bf16.msra.mxu0 %v687_v21  ;;  %v390_v26 = vld [vmem:[%s1059_s5 + $0x10] sm:$0xff] }
  0x96   :  { %v926_v27 = vpack.c.bf16 %v389_v23, %v388_v22 }
  0x97   :  { %v856_v32 = vsub.f32 %v788_v2, %v69_v28  ;;  %v859_v33 = vsub.f32 %v797_v5, %v71_v29  ;;  %v98_v34 = vsel %vm36_vm0, %v88_v30, 0.0  ;;  %v104_v37 = vsel %vm36_vm0, %v90_v31, 0.0  ;;  %v391_v28 = vld [vmem:[%s1059_s5 + $0x18] sm:$0xff] }
  0x98   :  { %99 = vadd.xlane.f32.xlu0 %v98_v34  ;;  %v51_v35 = vpop.xlane.xlu0 %50  ;;  %v54_v36 = vpop.xlane.xlu1 %53  ;;  %692 = vmatprep.subr.bf16.mxu0 %v926_v27  ;;  %v933_v29 = vpack.c.bf16 %v391_v28, %v390_v26 }
  0x99   :  { %v72_v38 = vmul.f32 0.03125, %v51_v35  ;;  %v73_v39 = vmul.f32 0.03125, %v54_v36  ;;  %v89_v40 = vmul.f32 %v856_v32, %v856_v32  ;;  %v91_v41 = vmul.f32 %v859_v33, %v859_v33  ;;  %707 = vmatprep.subr.bf16.mxu1 %v926_v27 }
  0x9a   :  { %711 = vmatpush3.bf16.msra.mxu1 %v926_v27 }
  0x9b   :  { %v868_v42 = vsub.f32 %v806_v8, %v72_v38  ;;  %v871_v43 = vsub.f32 %v811_v9, %v73_v39  ;;  %v101_v44 = vsel %vm36_vm0, %v89_v40, 0.0  ;;  %v107_v47 = vsel %vm36_vm0, %v91_v41, 0.0  ;;  %708 = vmatprep.subr.bf16.mxu1 %v933_v29 }
  0x9c   :  { %105 = vadd.xlane.f32.xlu0 %v104_v37  ;;  %102 = vadd.xlane.f32.xlu1 %v101_v44  ;;  %v57_v45 = vpop.xlane.xlu0 %56  ;;  %v60_v46 = vpop.xlane.xlu1 %59 }
  0x9d   :  { %v74_v48 = vmul.f32 0.03125, %v57_v45  ;;  %v75_v49 = vmul.f32 0.03125, %v60_v46  ;;  %v92_v50 = vmul.f32 %v868_v42, %v868_v42  ;;  %v93_v51 = vmul.f32 %v871_v43, %v871_v43 }
  0x9e   :  { %712 = vmatpush3.bf16.msra.mxu1 %v933_v29 }
  0x9f   :  { %v880_v52 = vsub.f32 %v820_v12, %v74_v48  ;;  %v883_v53 = vsub.f32 %v825_v13, %v75_v49  ;;  %v110_v54 = vsel %vm36_vm0, %v92_v50, 0.0  ;;  %v113_v57 = vsel %vm36_vm0, %v93_v51, 0.0 }
  0xa0   :  { %108 = vadd.xlane.f32.xlu1 %v107_v47  ;;  %111 = vadd.xlane.f32.xlu0 %v110_v54  ;;  %v63_v55 = vpop.xlane.xlu0 %62  ;;  %v66_v56 = vpop.xlane.xlu1 %65 }
  0xa1   :  { %v76_v58 = vmul.f32 0.03125, %v63_v55  ;;  %v77_v59 = vmul.f32 0.03125, %v66_v56  ;;  %v94_v60 = vmul.f32 %v880_v52, %v880_v52  ;;  %v95_v61 = vmul.f32 %v883_v53, %v883_v53 }
  0xa3   :  { %v892_v62 = vsub.f32 %v834_v16, %v76_v58  ;;  %v895_v63 = vsub.f32 %v839_v17, %v77_v59  ;;  %v116_v3 = vsel %vm36_vm0, %v94_v60, 0.0  ;;  %v119_v4 = vsel %vm36_vm0, %v95_v61, 0.0  ;;  %v941_v58 = vld [vmem:[%s1060_s1] ss:$0 sm:$0xff] }
  0xa4   :  { %114 = vadd.xlane.f32.xlu1 %v113_v57  ;;  %117 = vadd.xlane.f32.xlu0 %v116_v3 }
  0xa5   :  { %v96_v6 = vmul.f32 %v892_v62, %v892_v62  ;;  %v97_v7 = vmul.f32 %v895_v63, %v895_v63 }
  0xa7   :  { %v122_v10 = vsel %vm36_vm0, %v96_v6, 0.0  ;;  %v125_v11 = vsel %vm36_vm0, %v97_v7, 0.0  ;;  %v574_v6 = vld [vmem:[%s1061_s2] ss:$0 sm:$0xff] }
  0xa8   :  { %120 = vadd.xlane.f32.xlu1 %v119_v4  ;;  %123 = vadd.xlane.f32.xlu0 %v122_v10 }
  0xac   :  { %126 = vadd.xlane.f32.xlu1 %v125_v11 }
 0x125   :  { %v100_v30 = vpop.xlane.xlu0 %99 }
 0x126   :  { %v128_v31 = vmul.f32 0.03125, %v100_v30 }
 0x128   :  { %v138_v34 = vadd.f32 1e-05, %v128_v31 }
 0x129   :  { %v103_v35 = vpop.xlane.xlu1 %102  ;;  %v106_v36 = vpop.xlane.xlu0 %105 }
 0x12a   :  { %715 = vrsqrt.f32 %v138_v34  ;;  %v129_v37 = vmul.f32 0.03125, %v103_v35  ;;  %v130_v38 = vmul.f32 0.03125, %v106_v36 }
 0x12c   :  { %v139_v39 = vadd.f32 1e-05, %v129_v37  ;;  %v140_v40 = vadd.f32 1e-05, %v130_v38 }
 0x12d   :  { %v109_v41 = vpop.xlane.xlu1 %108  ;;  %v112_v44 = vpop.xlane.xlu0 %111 }
 0x12e   :  { %717 = vrsqrt.f32 %v139_v39  ;;  %v131_v45 = vmul.f32 0.03125, %v109_v41  ;;  %v132_v46 = vmul.f32 0.03125, %v112_v44 }
 0x12f   :  { %719 = vrsqrt.f32 %v140_v40 }
 0x130   :  { %v141_v47 = vadd.f32 1e-05, %v131_v45  ;;  %v142_v48 = vadd.f32 1e-05, %v132_v46 }
 0x131   :  { %v115_v49 = vpop.xlane.xlu1 %114  ;;  %v118_v50 = vpop.xlane.xlu0 %117 }
 0x132   :  { %721 = vrsqrt.f32 %v141_v47  ;;  %v133_v51 = vmul.f32 0.03125, %v115_v49  ;;  %v134_v54 = vmul.f32 0.03125, %v118_v50 }
 0x133   :  { %723 = vrsqrt.f32 %v142_v48 }
 0x134   :  { %v716_v55 = vpop.eup %715  ;;  %v143_v56 = vadd.f32 1e-05, %v133_v51  ;;  %v144_v57 = vadd.f32 1e-05, %v134_v54 }
 0x135   :  { %v121_v59 = vpop.xlane.xlu1 %120  ;;  %v124_v60 = vpop.xlane.xlu0 %123  ;;  %v158_v61 = vmul.f32 %v716_v55, %v846_v24  ;;  %v392_v55 = vld [vmem:[%s1059_s5 + $0x20] sm:$0xff] }
 0x136   :  { %725 = vrsqrt.f32 %v143_v56  ;;  %v135_v3 = vmul.f32 0.03125, %v121_v59  ;;  %v136_v4 = vmul.f32 0.03125, %v124_v60  ;;  %v393_v56 = vld [vmem:[%s1059_s5 + $0x28] sm:$0xff]  ;;  %v575_v60 = vld [vmem:[%s1062_s4] ss:$0 sm:$0xff] }
 0x137   :  { %727 = vrsqrt.f32 %v144_v57  ;;  %v175_v7 = vmul.f32 %v941_v58, %v158_v61  ;;  %v699_v57 = vpack.c.bf16 %v393_v56, %v392_v55 }
 0x138   :  { %v718_v10 = vpop.eup %717  ;;  %v145_v11 = vadd.f32 1e-05, %v135_v3  ;;  %v146_v14 = vadd.f32 1e-05, %v136_v4 }
 0x139   :  { %v720_v15 = vpop.eup %719  ;;  %v127_v18 = vpop.xlane.xlu1 %126  ;;  %v192_v19 = vadd.f32 %v574_v6, %v175_v7  ;;  %v159_v20 = vmul.f32 %v718_v10, %v856_v32  ;;  %709 = vmatprep.subr.bf16.mxu1 %v699_v57 }
 0x13a   :  { %729 = vrsqrt.f32 %v145_v11  ;;  %v137_v24 = vmul.f32 0.03125, %v127_v18  ;;  %v160_v21 = vmul.f32 %v720_v15, %v849_v25  ;;  %713 = vmatpush3.bf16.msra.mxu1 %v699_v57 }
 0x13b   :  { %731 = vrsqrt.f32 %v146_v14  ;;  %637 = vmatprep.mubr.msk.f32.mxu0 %vm36_vm0, %v192_v19  ;;  %v176_v22 = vmul.f32 %v941_v58, %v159_v20 }
 0x13c   :  { %v722_v23 = vpop.eup %721  ;;  %v147_v26 = vadd.f32 1e-05, %v137_v24  ;;  %v177_v28 = vmul.f32 %v941_v58, %v160_v21 }
 0x13d   :  { %v724_v30 = vpop.eup %723  ;;  %v193_v31 = vadd.f32 %v574_v6, %v176_v22  ;;  %v161_v34 = vmul.f32 %v722_v23, %v859_v33 }
 0x13e   :  { %733 = vrsqrt.f32 %v147_v26  ;;  %v194_v35 = vadd.f32 %v574_v6, %v177_v28  ;;  %v162_v32 = vmul.f32 %v724_v30, %v868_v42 }
 0x13f   :  { %638 = vmatmul.mubr.msk.f32.vlgmr.msra.gmra.mrb[0].mxu0 %vm36_vm0, %v193_v31  ;;  %v178_v25 = vmul.f32 %v941_v58, %v161_v34 }
 0x140   :  { %v726_v36 = vpop.eup %725  ;;  %640 = vmatprep.mubr.msk.f32.mxu0 %vm36_vm0, %v194_v35  ;;  %v179_v37 = vmul.f32 %v941_v58, %v162_v32  ;;  %694 = vmatpush3.bf16.msra.mxu0 %v926_v27 }
 0x141   :  { %v728_v38 = vpop.eup %727  ;;  %v195_v39 = vadd.f32 %v574_v6, %v178_v25  ;;  %v163_v40 = vmul.f32 %v726_v36, %v871_v43  ;;  %696 = vmatprep.subr.bf16.mxu0 %v933_v29 }
 0x142   :  { %v196_v33 = vadd.f32 %v574_v6, %v179_v37  ;;  %v164_v42 = vmul.f32 %v728_v38, %v880_v52 }
 0x143   :  { %641 = vmatmul.mubr.msk.f32.gmra.mrb[2].mxu0 %vm36_vm0, %v195_v39  ;;  %v180_v41 = vmul.f32 %v941_v58, %v163_v40 }
 0x144   :  { %v730_v44 = vpop.eup %729  ;;  %643 = vmatprep.mubr.msk.f32.mxu0 %vm36_vm0, %v196_v33  ;;  %v181_v45 = vmul.f32 %v941_v58, %v164_v42  ;;  %698 = vmatpush3.bf16.msra.mxu0 %v933_v29 }
 0x145   :  { %v732_v27 = vpop.eup %731  ;;  %v197_v46 = vadd.f32 %v574_v6, %v180_v41  ;;  %v165_v43 = vmul.f32 %v730_v44, %v883_v53  ;;  %700 = vmatprep.subr.bf16.mxu0 %v699_v57 }
 0x146   :  { %v198_v47 = vadd.f32 %v574_v6, %v181_v45  ;;  %v166_v48 = vmul.f32 %v732_v27, %v892_v62 }
 0x147   :  { %644 = vmatmul.mubr.msk.f32.gmra.mrb[4].mxu0 %vm36_vm0, %v197_v46  ;;  %v182_v52 = vmul.f32 %v941_v58, %v165_v43 }
 0x148   :  { %v734_v49 = vpop.eup %733  ;;  %646 = vmatprep.mubr.msk.f32.mxu0 %vm36_vm0, %v198_v47  ;;  %v183_v50 = vmul.f32 %v941_v58, %v166_v48  ;;  %702 = vmatpush3.bf16.msra.mxu0 %v699_v57 }
 0x149   :  { %v199_v51 = vadd.f32 %v574_v6, %v182_v52  ;;  %v167_v54 = vmul.f32 %v734_v49, %v895_v63  ;;  %v394_v63 = vld [vmem:[%s1059_s5 + $0x30] sm:$0xff]  ;;  %v586_v49 = vld [vmem:[%s1063_s6] ss:$0 sm:$0xff] }
 0x14a   :  { %v200_v29 = vadd.f32 %v574_v6, %v183_v50 }
 0x14b   :  { %647 = vmatmul.mubr.msk.f32.gmra.mrb[6].mxu0 %vm36_vm0, %v199_v51  ;;  %v184_v53 = vmul.f32 %v941_v58, %v167_v54  ;;  %v395_v58 = vld [vmem:[%s1059_s5 + $0x38] sm:$0xff] }
 0x14c   :  { %649 = vmatprep.mubr.msk.f32.mxu0 %vm36_vm0, %v200_v29  ;;  %v703_v59 = vpack.c.bf16 %v395_v58, %v394_v63 }
 0x14d   :  { %v201_v62 = vadd.f32 %v574_v6, %v184_v53 }
 0x14e   :  { %704 = vmatprep.subr.bf16.mxu0 %v703_v59  ;;  %710 = vmatprep.subr.bf16.mxu1 %v703_v59 }
 0x14f   :  { %650 = vmatmul.mubr.msk.f32.gmra.mrb[8].mxu0 %vm36_vm0, %v201_v62  ;;  %714 = vmatpush3.bf16.msra.mxu1 %v703_v59 }
 0x150   :  { %706 = vmatpush3.bf16.msra.mxu0 %v703_v59 }
 0x212   :  { %v639_v61 = vpop.f32.mrb[0].mxu0 }
 0x213   :  { %v315_v3 = vadd.f32 %v639_v61, %v575_v60  ;;  %v309_v4 = vpop.f32.mrb[1].mxu0 }
 0x214   :  { %v310_v6 = vadd.f32 %v575_v60, %v309_v4 }
 0x215   :  { %v369_v7 = vmul.f32 0.01, %v315_v3  ;;  %vm359_vm1 = vcmp.ge.f32.partialorder %v315_v3, 0.0 }
 0x216   :  { %vm358_vm2 = vcmp.ge.f32.partialorder %v310_v6, 0.0  ;;  %v368_v10 = vmul.f32 0.01, %v310_v6  ;;  %v642_v11 = vpop.f32.mrb[2].mxu0 }
 0x217   :  { %v325_v14 = vadd.f32 %v642_v11, %v575_v60  ;;  %v319_v15 = vpop.f32.mrb[3].mxu0  ;;  %v379_v20 = vsel %vm359_vm1, %v315_v3, %v369_v7 }
 0x218   :  { %v320_v18 = vadd.f32 %v575_v60, %v319_v15  ;;  %v378_v19 = vsel %vm358_vm2, %v310_v6, %v368_v10 }
 0x219   :  { %v371_v24 = vmul.f32 0.01, %v325_v14  ;;  %668 = vmatprep.mubr.msk.f32.mxu0 %vm403_vm3, %v378_v19  ;;  %vm361_vm4 = vcmp.ge.f32.partialorder %v325_v14, 0.0 }
 0x21a   :  { %v645_v21 = vpop.f32.mrb[4].mxu0  ;;  %669 = vmatmul.mubr.msk.f32.vlgmr.msra.gmra.mrb[10].mxu0 %vm403_vm3, %v379_v20  ;;  %vm360_vm5 = vcmp.ge.f32.partialorder %v320_v18, 0.0  ;;  %v370_v22 = vmul.f32 0.01, %v320_v18 }
 0x21b   :  { %v335_v23 = vadd.f32 %v645_v21, %v575_v60  ;;  %v329_v26 = vpop.f32.mrb[5].mxu0  ;;  %v381_v34 = vsel %vm361_vm4, %v325_v14, %v371_v24 }
 0x21c   :  { %v330_v28 = vadd.f32 %v575_v60, %v329_v26  ;;  %v380_v30 = vsel %vm360_vm5, %v320_v18, %v370_v22 }
 0x21d   :  { %v373_v31 = vmul.f32 0.01, %v335_v23  ;;  %671 = vmatprep.mubr.msk.f32.mxu1 %vm403_vm3, %v380_v30  ;;  %vm363_vm6 = vcmp.ge.f32.partialorder %v335_v23, 0.0 }
 0x21e   :  { %vm362_vm7 = vcmp.ge.f32.partialorder %v330_v28, 0.0  ;;  %v372_v35 = vmul.f32 0.01, %v330_v28  ;;  %v648_v32 = vpop.f32.mrb[6].mxu0  ;;  %672 = vmatmul.mubr.msk.f32.vlgmr.msra.gmra.mrb[0].mxu1 %vm403_vm3, %v381_v34 }
 0x21f   :  { %v345_v25 = vadd.f32 %v648_v32, %v575_v60  ;;  %v339_v36 = vpop.f32.mrb[7].mxu0  ;;  %v383_v40 = vsel %vm363_vm6, %v335_v23, %v373_v31 }
 0x220   :  { %v340_v37 = vadd.f32 %v575_v60, %v339_v36  ;;  %v382_v38 = vsel %vm362_vm7, %v330_v28, %v372_v35 }
 0x221   :  { %v375_v39 = vmul.f32 0.01, %v345_v25  ;;  %674 = vmatprep.mubr.msk.f32.mxu1 %vm403_vm3, %v382_v38  ;;  %vm365_vm8 = vcmp.ge.f32.partialorder %v345_v25, 0.0 }
 0x222   :  { %vm364_vm9 = vcmp.ge.f32.partialorder %v340_v37, 0.0  ;;  %v374_v33 = vmul.f32 0.01, %v340_v37  ;;  %v651_v42 = vpop.f32.mrb[8].mxu0  ;;  %675 = vmatmul.mubr.msk.f32.gmra.mrb[2].mxu1 %vm403_vm3, %v383_v40 }
 0x223   :  { %v355_v41 = vadd.f32 %v651_v42, %v575_v60  ;;  %v349_v44 = vpop.f32.mrb[9].mxu0  ;;  %v385_v43 = vsel %vm365_vm8, %v345_v25, %v375_v39 }
 0x224   :  { %v350_v45 = vadd.f32 %v575_v60, %v349_v44  ;;  %v384_v27 = vsel %vm364_vm9, %v340_v37, %v374_v33 }
 0x225   :  { %v377_v46 = vmul.f32 0.01, %v355_v41  ;;  %677 = vmatprep.mubr.msk.f32.mxu1 %vm403_vm3, %v384_v27  ;;  %vm367_vm10 = vcmp.ge.f32.partialorder %v355_v41, 0.0 }
 0x226   :  { %vm366_vm11 = vcmp.ge.f32.partialorder %v350_v45, 0.0  ;;  %v376_v47 = vmul.f32 0.01, %v350_v45  ;;  %678 = vmatmul.mubr.msk.f32.gmra.mrb[4].mxu1 %vm403_vm3, %v385_v43 }
 0x227   :  { %v387_v52 = vsel %vm367_vm10, %v355_v41, %v377_v46 }
 0x228   :  { %v386_v48 = vsel %vm366_vm11, %v350_v45, %v376_v47 }
 0x229   :  { %680 = vmatprep.mubr.msk.f32.mxu1 %vm403_vm3, %v386_v48 }
 0x22a   :  { %681 = vmatmul.mubr.msk.f32.gmra.mrb[6].mxu1 %vm403_vm3, %v387_v52 }
 0x2ed   :  { %v670_v50 = vpop.f32.mrb[10].mxu0 }
 0x2ee   :  { %v506_v51 = vadd.f32 %v670_v50, %v586_v49  ;;  %v500_v54 = vpop.f32.mrb[11].mxu0 }
 0x2ef   :  { %v501_v29 = vadd.f32 %v586_v49, %v500_v54 }
 0x2f0   :  { %v550_v53 = vadd.f32 %v506_v51, %v788_v2 }
 0x2f1   :  { %v549_v62 = vadd.f32 %v501_v29, %v778_v0  ;;  %v673_v55 = vpop.f32.mrb[0].mxu1 }
 0x2f2   :  { %560 = vst.msk [vmem:[%s1064_s7 + $0x8] sm:$0xff] %vm36_vm0, %v550_v53  ;;  %v516_v56 = vadd.f32 %v673_v55, %v586_v49  ;;  %v510_v57 = vpop.f32.mrb[1].mxu1 }
 0x2f3   :  { %559 = vst.msk [vmem:[%s1064_s7] sm:$0xff] %vm36_vm0, %v549_v62  ;;  %v511_v63 = vadd.f32 %v586_v49, %v510_v57 }
 0x2f4   :  { %v552_v58 = vadd.f32 %v516_v56, %v797_v5 }
 0x2f5   :  { %v551_v2 = vadd.f32 %v511_v63, %v783_v1  ;;  %v676_v59 = vpop.f32.mrb[2].mxu1 }
 0x2f6   :  { %562 = vst.msk [vmem:[%s1064_s7 + $0x18] sm:$0xff] %vm36_vm0, %v552_v58  ;;  %v526_v0 = vadd.f32 %v676_v59, %v586_v49  ;;  %v520_v60 = vpop.f32.mrb[3].mxu1 }
 0x2f7   :  { %561 = vst.msk [vmem:[%s1064_s7 + $0x10] sm:$0xff] %vm36_vm0, %v551_v2  ;;  %v521_v61 = vadd.f32 %v586_v49, %v520_v60 }
 0x2f8   :  { %v554_v3 = vadd.f32 %v526_v0, %v811_v9 }
 0x2f9   :  { %v553_v5 = vadd.f32 %v521_v61, %v806_v8  ;;  %v679_v4 = vpop.f32.mrb[4].mxu1 }
 0x2fa   :  { %564 = vst.msk [vmem:[%s1064_s7 + $0x28] sm:$0xff] %vm36_vm0, %v554_v3  ;;  %v536_v1 = vadd.f32 %v679_v4, %v586_v49  ;;  %v530_v6 = vpop.f32.mrb[5].mxu1 }
 0x2fb   :  { %563 = vst.msk [vmem:[%s1064_s7 + $0x20] sm:$0xff] %vm36_vm0, %v553_v5  ;;  %v531_v7 = vadd.f32 %v586_v49, %v530_v6 }
 0x2fc   :  { %v556_v10 = vadd.f32 %v536_v1, %v825_v13 }
 0x2fd   :  { %v555_v9 = vadd.f32 %v531_v7, %v820_v12  ;;  %v682_v11 = vpop.f32.mrb[6].mxu1 }
 0x2fe   :  { %566 = vst.msk [vmem:[%s1064_s7 + $0x38] sm:$0xff] %vm36_vm0, %v556_v10  ;;  %v546_v8 = vadd.f32 %v682_v11, %v586_v49  ;;  %v540_v14 = vpop.f32.mrb[7].mxu1 }
 0x2ff   :  { %565 = vst.msk [vmem:[%s1064_s7 + $0x30] sm:$0xff] %vm36_vm0, %v555_v9  ;;  %v541_v15 = vadd.f32 %v586_v49, %v540_v14 }
 0x300   :  { %v558_v18 = vadd.f32 %v546_v8, %v839_v17 }
 0x301   :  { %v557_v13 = vadd.f32 %v541_v15, %v834_v16 }
 0x302   :  { %568 = vst.msk [vmem:[%s1064_s7 + $0x48] sm:$0xff] %vm36_vm0, %v558_v18 }
 0x303   :  { %567 = vst.msk [vmem:[%s1064_s7 + $0x40] sm:$0xff] %vm36_vm0, %v557_v13 }

// kernel: lmha_transformer_block_forward.4
= control target key start
LH: loop header
LB: loop body
LE: loop exit
PB: predicated region body
PF: predicated region fallthrough
CT: control target
= control target key end

     0   :  { %s2756_s21 = smov 0   ;;  %s2758_s22 = smov 0   ;;  %s3742_s0 = inlined_call_operand.vmem [shape: bf16[3,4,128,16], index: 0, kind: input, shape index: {}, may-alias: {0,1,2,3,4}]   ;;  %s3743_s1 = inlined_call_operand.vmem [shape: bf16[3,4,128,16], index: 1, kind: input, shape index: {}, may-alias: {0,1,2,3,4}]   ;;  %s3744_s2 = inlined_call_operand.vmem [shape: bf16[3,4,128,16], index: 2, kind: input, shape index: {}, may-alias: {0,1,2,3,4}]   ;;  %s3745_s3 = inlined_call_operand.vmem [shape: bf16[3,4,128,16], index: 3, kind: input, shape index: {}, may-alias: {0,1,2,3,4}]   ;;  %s3746_s4 = inlined_call_operand.vmem [shape: bf16[3,4,128,16], index: 4, kind: input, shape index: {}, may-alias: {0,1,2,3,4}]   ;;  %s3747_s5 = inlined_call_operand.vmem [shape: f32[128,16], index: 5, kind: input, shape index: {}]   ;;  %s3748_s6 = inlined_call_operand.vmem [shape: f32[128,16], index: 6, kind: input, shape index: {}]   ;;  %s3749_s7 = inlined_call_operand.vmem [shape: f32[144,16], index: 7, kind: input, shape index: {}]   ;;  %s3750_s8 = inlined_call_operand.vmem [shape: f32[144,16], index: 8, kind: input, shape index: {}]   ;;  %s3751_s9 = inlined_call_operand.vmem [shape: f32[16,16], index: 9, kind: input, shape index: {}]   ;;  %s3752_s10 = inlined_call_operand.vmem [shape: s32[1,144], index: 10, kind: input, shape index: {}]   ;;  %s3753_s11 = inlined_call_operand.vmem [shape: f32[128,144], index: 11, kind: input, shape index: {}]   ;;  %s3754_s12 = inlined_call_operand.vmem [shape: f32[4,128,16], index: 12, kind: output, shape index: {}]  }
   0x1   :  { %s2760_s23 = smov 0  }
   0x2 LB: > { %s34_s24 = sadd.s32 1, %s2683_s22  ;;  %p2229_p0 = scmp.ge.s32.totalorder %s2687_s23, 1  ;;  %s2687_s23 = sphi %s2760_s23, %s22_s23   ;;  %s2683_s22 = sphi %s2758_s22, %s3757_s22   ;;  %s2679_s21 = sphi %s2756_s21, %s3756_s21  }
   0x3   : > { %p36_p1 = scmp.ge.s32.totalorder %s34_s24, 4  ;;  %p487_p2 = scmp.lt.s32.totalorder %s2687_s23, 5 }
   0x5   : > { %s3759_s24 = smov (%p36_p1, %s34_s24), 0  ;;  %p488_p3 = pnand %p2229_p0, %p487_p2 }
   0x6   : > { %v666_v0 = vld [vmem:[%s3751_s9] sm:$0xff] (!%p488_p3)  ;;  %v667_v1 = vld [vmem:[%s3751_s9 + $0x8] sm:$0xff] (!%p488_p3)  ;;  %p586_p4 = scmp.lt.s32.totalorder (!%p488_p3), %s2679_s21, 3  ;;  %vm732_vm0 = vcmask (!%p488_p3), 130048   ;;  %v2689_v54 = vmov (!%p488_p3), 0   ;;  %v703_v62 = vld [vmem:[%s3747_s5 + $0x18] sm:$0xff] (!%p488_p3) }
   0x7   : > { %491 = sbr.rel (%p488_p3) target bundleno = 1002 (0x3ea), region = 68  ;;  %v2526_v2 = vpack.c.bf16 (!%p488_p3), %v667_v1, %v666_v0  ;;  %1489 = vmatprep.subr.bf16.mxu0 (!%p488_p3), %v2689_v54  ;;  %1521 = vmatprep.mubr.bf16.mxu0 (!%p488_p3), %v2689_v54  ;;  %v701_v55 = vld [vmem:[%s3747_s5 + $0x8] sm:$0xff] (!%p488_p3)  ;;  %v700_v56 = vld [vmem:[%s3747_s5] sm:$0xff] (!%p488_p3)  ;;  %v702_v1 = vld [vmem:[%s3747_s5 + $0x10] sm:$0xff] (!%p488_p3) }
   0x8   : > { %v927_v57 = vld [vmem:[%s3748_s6 + $0x8] sm:$0xff] (!%p488_p3)  ;;  %v926_v59 = vld [vmem:[%s3748_s6] sm:$0xff] (!%p488_p3) }
   0x9   : > { %2527 = vmatprep.subr.bf16.mxu1 (!%p488_p3), %v2526_v2 }
   0xa   : > { %2529 = vmatpush3.bf16.msra.mxu1 (!%p488_p3), %v2526_v2 }
   0xb   : > { %2531 = vmatprep.subr.bf16.mxu1 (!%p488_p3), %v2526_v2 }
   0xe   : > { %s3761_s21 = smov (!%p586_p4, %s2679_s21), 3 }
   0xf   : > { %s2783_s29 = sshll.u32 %s3761_s21, 6 }
  0x10   : > { %s2789_s14 = scalar_lea.vmem %s3742_s0, %s2783_s29  ;;  %s2810_s17 = scalar_lea.vmem %s3746_s4, %s2783_s29 }
  0x11   : > { %v2792_v3 = vld [vmem:[%s2789_s14] sm:$0xff]   ;;  %v2795_v4 = vld [vmem:[%s2789_s14 + $0x8] sm:$0xff]   ;;  %v2801_v8 = vld [vmem:[%s2789_s14 + $0x10] sm:$0xff]   ;;  %s2143_s20 = scalar_lea.vmem %s3743_s1, %s2783_s29  ;;  %s2885_s27 = scalar_lea.vmem %s3744_s2, %s2783_s29 }
  0x12   : > { %v2347_v5 = vunpack.c.l.bf16 %v2792_v3  ;;  %v2348_v6 = vunpack.c.h.bf16 %v2792_v3  ;;  %v2351_v7 = vunpack.c.l.bf16 %v2795_v4  ;;  %v2352_v9 = vunpack.c.h.bf16 %v2795_v4  ;;  %v2821_v11 = vld [vmem:[%s2789_s14 + $0x18] sm:$0xff]   ;;  %v2828_v13 = vld [vmem:[%s2789_s14 + $0x20] sm:$0xff]   ;;  %v2843_v17 = vld [vmem:[%s2789_s14 + $0x28] sm:$0xff]   ;;  %s2153_s18 = scalar_lea.vmem %s3745_s3, %s2783_s29 }
  0x13   : > { %v2355_v10 = vunpack.c.l.bf16 %v2801_v8  ;;  %v2356_v12 = vunpack.c.h.bf16 %v2801_v8  ;;  %v2359_v14 = vunpack.c.l.bf16 %v2821_v11  ;;  %v2360_v15 = vunpack.c.h.bf16 %v2821_v11  ;;  %v2854_v20 = vld [vmem:[%s2789_s14 + $0x30] sm:$0xff]   ;;  %v2865_v23 = vld [vmem:[%s2789_s14 + $0x38] sm:$0xff]   ;;  %v2879_v26 = vld [vmem:[%s2143_s20 + $0x100] sm:$0xff]  }
  0x14   : > { %2471 = vmatprep.mubr.msk.f32.mxu1 %vm732_vm0, %v2347_v5  ;;  %v2363_v16 = vunpack.c.l.bf16 %v2828_v13  ;;  %v2364_v18 = vunpack.c.h.bf16 %v2828_v13  ;;  %v2367_v19 = vunpack.c.l.bf16 %v2843_v17  ;;  %v2368_v21 = vunpack.c.h.bf16 %v2843_v17  ;;  %v2896_v29 = vld [vmem:[%s2885_s27 + $0x100] sm:$0xff]   ;;  %v2907_v32 = vld [vmem:[%s2885_s27 + $0x108] sm:$0xff]   ;;  %v2918_v35 = vld [vmem:[%s2885_s27 + $0x110] sm:$0xff]  }
  0x15   : > { %2472 = vmatmul.mubr.msk.f32.vlgmr.msra.gmra.mrb[0].mxu1 %vm732_vm0, %v2348_v6  ;;  %v2371_v22 = vunpack.c.l.bf16 %v2854_v20  ;;  %v2372_v24 = vunpack.c.h.bf16 %v2854_v20  ;;  %v2375_v25 = vunpack.c.l.bf16 %v2865_v23  ;;  %v2376_v27 = vunpack.c.h.bf16 %v2865_v23  ;;  %v2929_v38 = vld [vmem:[%s2885_s27 + $0x118] sm:$0xff]   ;;  %v2940_v41 = vld [vmem:[%s2885_s27 + $0x120] sm:$0xff]   ;;  %v2951_v44 = vld [vmem:[%s2885_s27 + $0x128] sm:$0xff]  }
  0x16   : > { %2533 = vmatpush3.bf16.msra.mxu1 %v2526_v2  ;;  %2474 = vmatprep.mubr.msk.f32.mxu1 %vm732_vm0, %v2351_v7  ;;  %v2379_v28 = vunpack.c.l.bf16 %v2879_v26  ;;  %v2380_v30 = vunpack.c.h.bf16 %v2879_v26  ;;  %v2383_v31 = vunpack.c.l.bf16 %v2896_v29  ;;  %v2384_v33 = vunpack.c.h.bf16 %v2896_v29  ;;  %v2962_v47 = vld [vmem:[%s2885_s27 + $0x130] sm:$0xff]   ;;  %v2973_v50 = vld [vmem:[%s2885_s27 + $0x138] sm:$0xff]  }
  0x17   : > { %v2387_v34 = vunpack.c.l.bf16 %v2907_v32  ;;  %v2388_v36 = vunpack.c.h.bf16 %v2907_v32  ;;  %v2391_v37 = vunpack.c.l.bf16 %v2918_v35  ;;  %v2392_v39 = vunpack.c.h.bf16 %v2918_v35  ;;  %1909 = vmatprep.subr.bf16.mxu1 %v2689_v54  ;;  %v1262_v32 = vld [vmem:[%s3750_s8 + $0x38] sm:$0xff] }
  0x18   : > { %v2395_v40 = vunpack.c.l.bf16 %v2929_v38  ;;  %v2396_v42 = vunpack.c.h.bf16 %v2929_v38  ;;  %v2399_v43 = vunpack.c.l.bf16 %v2940_v41  ;;  %v2400_v45 = vunpack.c.h.bf16 %v2940_v41  ;;  %v1266_v38 = vld [vmem:[%s3750_s8 + $0x58] sm:$0xff] }
  0x19   : > { %2475 = vmatmul.mubr.msk.f32.gmra.mrb[2].mxu1 %vm732_vm0, %v2352_v9  ;;  %v2403_v46 = vunpack.c.l.bf16 %v2951_v44  ;;  %v2404_v48 = vunpack.c.h.bf16 %v2951_v44  ;;  %v2407_v49 = vunpack.c.l.bf16 %v2962_v47  ;;  %v2408_v51 = vunpack.c.h.bf16 %v2962_v47  ;;  %v1270_v44 = vld [vmem:[%s3750_s8 + $0x78] sm:$0xff] }
  0x1a   : > { %2477 = vmatprep.mubr.msk.f32.mxu1 %vm732_vm0, %v2355_v10  ;;  %v2411_v52 = vunpack.c.l.bf16 %v2973_v50  ;;  %v2412_v53 = vunpack.c.h.bf16 %v2973_v50  ;;  %v717_v58 = vmul.f32 %v2348_v6, %v701_v55  ;;  %v716_v60 = vmul.f32 %v2347_v5, %v700_v56  ;;  %v929_v6 = vld [vmem:[%s3748_s6 + $0x18] sm:$0xff]  ;;  %v928_v5 = vld [vmem:[%s3748_s6 + $0x10] sm:$0xff] }
  0x1b   : > { %v719_v3 = vmul.f32 %v2352_v9, %v703_v62  ;;  %v704_v9 = vld [vmem:[%s3747_s5 + $0x20] sm:$0xff] }
  0x1d   : > { %2478 = vmatmul.mubr.msk.f32.gmra.mrb[4].mxu1 %vm732_vm0, %v2356_v12 }
  0x1e   : > { %2480 = vmatprep.mubr.msk.f32.mxu1 %vm732_vm0, %v2359_v14 }
  0x21   : > { %2481 = vmatmul.mubr.msk.f32.gmra.mrb[6].mxu1 %vm732_vm0, %v2360_v15 }
  0x22   : > { %2483 = vmatprep.mubr.msk.f32.mxu1 %vm732_vm0, %v2363_v16 }
  0x25   : > { %2484 = vmatmul.mubr.msk.f32.gmra.mrb[8].mxu1 %vm732_vm0, %v2364_v18 }
  0x26   : > { %2486 = vmatprep.mubr.msk.f32.mxu1 %vm732_vm0, %v2367_v19 }
  0x29   : > { %2487 = vmatmul.mubr.msk.f32.gmra.mrb[10].mxu1 %vm732_vm0, %v2368_v21 }
  0x2a   : > { %2489 = vmatprep.mubr.msk.f32.mxu1 %vm732_vm0, %v2371_v22 }
  0x2d   : > { %2490 = vmatmul.mubr.msk.f32.gmra.mrb[12].mxu1 %vm732_vm0, %v2372_v24 }
  0x2e   : > { %2492 = vmatprep.mubr.msk.f32.mxu1 %vm732_vm0, %v2375_v25 }
  0x31   : > { %2493 = vmatmul.mubr.msk.f32.gmra.mrb[14].mxu1 %vm732_vm0, %v2376_v27 }
  0x32   : > { %2499 = vmatprep.mubr.msk.f32.mxu1 %vm732_vm0, %v2379_v28 }
  0x35   : > { %2500 = vmatmul.mubr.msk.f32.vlgmr.msra.gmra.mrb[16].mxu1 %vm732_vm0, %v2380_v30 }
  0x36   : > { %2502 = vmatprep.mubr.msk.f32.mxu1 %vm732_vm0, %v2383_v31 }
  0x39   : > { %2503 = vmatmul.mubr.msk.f32.gmra.mrb[18].mxu1 %vm732_vm0, %v2384_v33 }
  0x3a   : > { %2505 = vmatprep.mubr.msk.f32.mxu1 %vm732_vm0, %v2387_v34 }
  0x3d   : > { %2506 = vmatmul.mubr.msk.f32.gmra.mrb[20].mxu1 %vm732_vm0, %v2388_v36 }
  0x3e   : > { %2508 = vmatprep.mubr.msk.f32.mxu1 %vm732_vm0, %v2391_v37 }
  0x41   : > { %2509 = vmatmul.mubr.msk.f32.gmra.mrb[22].mxu1 %vm732_vm0, %v2392_v39 }
  0x42   : > { %2511 = vmatprep.mubr.msk.f32.mxu1 %vm732_vm0, %v2395_v40 }
  0x45   : > { %2512 = vmatmul.mubr.msk.f32.gmra.mrb[24].mxu1 %vm732_vm0, %v2396_v42 }
  0x46   : > { %2514 = vmatprep.mubr.msk.f32.mxu1 %vm732_vm0, %v2399_v43 }
  0x49   : > { %2515 = vmatmul.mubr.msk.f32.gmra.mrb[26].mxu1 %vm732_vm0, %v2400_v45 }
  0x4a   : > { %2517 = vmatprep.mubr.msk.f32.mxu1 %vm732_vm0, %v2403_v46 }
  0x4d   : > { %2518 = vmatmul.mubr.msk.f32.gmra.mrb[28].mxu1 %vm732_vm0, %v2404_v48 }
  0x4e   : > { %2520 = vmatprep.mubr.msk.f32.mxu1 %vm732_vm0, %v2407_v49 }
  0x51   : > { %2521 = vmatmul.mubr.msk.f32.gmra.mrb[30].mxu1 %vm732_vm0, %v2408_v51 }
  0x52   : > { %2523 = vmatprep.mubr.msk.f32.mxu1 %vm732_vm0, %v2411_v52 }
  0x55   : > { %2524 = vmatmul.mubr.msk.f32.gmra.mrb[32].mxu1 %vm732_vm0, %v2412_v53 }
  0xe8   : > { %v2473_v61 = vpop.f32.mrb[0].mxu1 }
  0xe9   : > { %v943_v63 = vmul.f32 %v2473_v61, %v927_v57  ;;  %v847_v0 = vpop.f32.mrb[1].mxu1  ;;  %v718_v61 = vmul.f32 %v2351_v7, %v702_v1  ;;  %v930_v1 = vld [vmem:[%s3748_s6 + $0x20] sm:$0xff] }
  0xea   : > { %v942_v2 = vmul.f32 %v926_v59, %v847_v0  ;;  %v705_v59 = vld [vmem:[%s3747_s5 + $0x28] sm:$0xff] }
  0xeb   : > { %v3021_v55 = vadd.f32 %v943_v63, %v717_v58  ;;  %v721_v7 = vmul.f32 %v2356_v12, %v705_v59  ;;  %v706_v12 = vld [vmem:[%s3747_s5 + $0x30] sm:$0xff] }
  0xec   : > { %v3028_v56 = vadd.f32 %v942_v2, %v716_v60  ;;  %v2476_v57 = vpop.f32.mrb[2].mxu1  ;;  %v931_v60 = vld [vmem:[%s3748_s6 + $0x28] sm:$0xff] }
  0xed   : > { %v945_v0 = vmul.f32 %v2476_v57, %v929_v6  ;;  %v857_v58 = vpop.f32.mrb[3].mxu1  ;;  %v720_v57 = vmul.f32 %v2355_v10, %v704_v9  ;;  %v932_v9 = vld [vmem:[%s3748_s6 + $0x30] sm:$0xff] }
  0xee   : > { %v1381_v62 = vpack.c.bf16 %v3021_v55, %v3028_v56  ;;  %v944_v63 = vmul.f32 %v928_v5, %v857_v58  ;;  %v707_v5 = vld [vmem:[%s3747_s5 + $0x38] sm:$0xff]  ;;  %v2560_v56 = vld [vmem:[%s2153_s18 + $0x200] sm:$0xff]  }
  0xef   : > { %v3043_v4 = vadd.f32 %v945_v0, %v719_v3  ;;  %v723_v10 = vmul.f32 %v2360_v15, %v707_v5  ;;  %v708_v15 = vld [vmem:[%s3747_s5 + $0x40] sm:$0xff]  ;;  %1910 = vmatpush1.bf16.msra.mxu1 %v2560_v56 }
  0xf0   : > { %v3050_v2 = vadd.f32 %v944_v63, %v718_v61  ;;  %v2479_v6 = vpop.f32.mrb[4].mxu1  ;;  %v933_v61 = vld [vmem:[%s3748_s6 + $0x38] sm:$0xff]  ;;  %1911 = vmatprep.subr.bf16.mxu1 %v2689_v54 }
  0xf1   : > { %v947_v58 = vmul.f32 %v2479_v6, %v931_v60  ;;  %v867_v3 = vpop.f32.mrb[5].mxu1  ;;  %v722_v6 = vmul.f32 %v2359_v14, %v706_v12  ;;  %v934_v12 = vld [vmem:[%s3748_s6 + $0x40] sm:$0xff] }
  0xf2   : > { %v1382_v59 = vpack.c.bf16 %v3043_v4, %v3050_v2  ;;  %v946_v0 = vmul.f32 %v930_v1, %v867_v3  ;;  %v709_v1 = vld [vmem:[%s3747_s5 + $0x48] sm:$0xff]  ;;  %v2563_v2 = vld [vmem:[%s2810_s17 + $0x210] sm:$0xff]  }
  0xf3   : > { %v3065_v8 = vadd.f32 %v947_v58, %v721_v7  ;;  %v725_v14 = vmul.f32 %v2364_v18, %v709_v1  ;;  %v710_v18 = vld [vmem:[%s3747_s5 + $0x50] sm:$0xff]  ;;  %v2562_v4 = vld [vmem:[%s2810_s17 + $0x208] sm:$0xff]  }
  0xf4   : > { %v3072_v63 = vadd.f32 %v946_v0, %v720_v57  ;;  %v2482_v60 = vpop.f32.mrb[6].mxu1  ;;  %v935_v57 = vld [vmem:[%s3748_s6 + $0x48] sm:$0xff] }
  0xf5   : > { %v949_v3 = vmul.f32 %v2482_v60, %v933_v61  ;;  %v877_v7 = vpop.f32.mrb[7].mxu1  ;;  %v724_v60 = vmul.f32 %v2363_v16, %v708_v15  ;;  %v936_v15 = vld [vmem:[%s3748_s6 + $0x50] sm:$0xff] }
  0xf6   : > { %v1383_v5 = vpack.c.bf16 %v3065_v8, %v3072_v63  ;;  %v948_v58 = vmul.f32 %v932_v9, %v877_v7  ;;  %v711_v9 = vld [vmem:[%s3747_s5 + $0x58] sm:$0xff]  ;;  %v1603_v8 = vlaneseq }
  0xf7   : > { %v3087_v11 = vadd.f32 %v949_v3, %v723_v10  ;;  %v727_v16 = vmul.f32 %v2368_v21, %v711_v9  ;;  %v712_v21 = vld [vmem:[%s3747_s5 + $0x60] sm:$0xff] }
  0xf8   : > { %v3094_v0 = vadd.f32 %v948_v58, %v722_v6  ;;  %v2485_v61 = vpop.f32.mrb[8].mxu1  ;;  %v937_v6 = vld [vmem:[%s3748_s6 + $0x58] sm:$0xff]  ;;  %v1604_v63 = vshrl.u32 %v1603_v8, 7  ;;  %v1418_v8 = vld [vmem:[%s3753_s11 + $0x60] sm:$0xff] }
  0xf9   : > { %v951_v7 = vmul.f32 %v2485_v61, %v935_v57  ;;  %v887_v10 = vpop.f32.mrb[9].mxu1  ;;  %v726_v61 = vmul.f32 %v2367_v19, %v710_v18  ;;  %v938_v18 = vld [vmem:[%s3748_s6 + $0x60] sm:$0xff] }
  0xfa   : > { %v1384_v1 = vpack.c.bf16 %v3087_v11, %v3094_v0  ;;  %v950_v3 = vmul.f32 %v934_v12, %v887_v10  ;;  %v713_v12 = vld [vmem:[%s3747_s5 + $0x68] sm:$0xff]  ;;  %v2690_v11 = vmov 0.0  }
  0xfb   : > { %v3109_v13 = vadd.f32 %v951_v7, %v725_v14  ;;  %v729_v19 = vmul.f32 %v2372_v24, %v713_v12  ;;  %v714_v24 = vld [vmem:[%s3747_s5 + $0x70] sm:$0xff] }
  0xfc   : > { %v3116_v58 = vadd.f32 %v950_v3, %v724_v60  ;;  %v2488_v57 = vpop.f32.mrb[10].mxu1  ;;  %v939_v60 = vld [vmem:[%s3748_s6 + $0x68] sm:$0xff] }
  0xfd   : > { %v953_v10 = vmul.f32 %v2488_v57, %v937_v6  ;;  %v897_v14 = vpop.f32.mrb[11].mxu1  ;;  %v728_v57 = vmul.f32 %v2371_v22, %v712_v21  ;;  %v940_v21 = vld [vmem:[%s3748_s6 + $0x70] sm:$0xff] }
  0xfe   : > { %v1385_v9 = vpack.c.bf16 %v3109_v13, %v3116_v58  ;;  %v952_v7 = vmul.f32 %v936_v15, %v897_v14  ;;  %v715_v15 = vld [vmem:[%s3747_s5 + $0x78] sm:$0xff]  ;;  %v1406_v13 = vld [vmem:[%s3753_s11] sm:$0xff]  ;;  %v1407_v58 = vld [vmem:[%s3753_s11 + $0x8] sm:$0xff] }
  0xff   : > { %v3131_v17 = vadd.f32 %v953_v10, %v727_v16  ;;  %v731_v22 = vmul.f32 %v2376_v27, %v715_v15  ;;  %v1010_v27 = vld [vmem:[%s3749_s7] sm:$0xff] }
 0x100   : > { %v3138_v3 = vadd.f32 %v952_v7, %v726_v61  ;;  %v2491_v6 = vpop.f32.mrb[12].mxu1  ;;  %v941_v61 = vld [vmem:[%s3748_s6 + $0x78] sm:$0xff] }
 0x101   : > { %v955_v14 = vmul.f32 %v2491_v6, %v939_v60  ;;  %v907_v16 = vpop.f32.mrb[13].mxu1  ;;  %v730_v6 = vmul.f32 %v2375_v25, %v714_v24  ;;  %v1255_v24 = vld [vmem:[%s3750_s8] sm:$0xff] }
 0x102   : > { %v1386_v12 = vpack.c.bf16 %v3131_v17, %v3138_v3  ;;  %v954_v10 = vmul.f32 %v938_v18, %v907_v16  ;;  %v1011_v18 = vld [vmem:[%s3749_s7 + $0x8] sm:$0xff] }
 0x103   : > { %v3153_v20 = vadd.f32 %v955_v14, %v729_v19  ;;  %v1029_v25 = vmul.f32 %v2380_v30, %v1011_v18  ;;  %v1012_v30 = vld [vmem:[%s3749_s7 + $0x10] sm:$0xff] }
 0x104   : > { %v3160_v7 = vadd.f32 %v954_v10, %v728_v57  ;;  %v2494_v60 = vpop.f32.mrb[14].mxu1  ;;  %v1256_v57 = vld [vmem:[%s3750_s8 + $0x8] sm:$0xff] }
 0x105   : > { %v957_v16 = vmul.f32 %v2494_v60, %v941_v61  ;;  %v917_v19 = vpop.f32.mrb[15].mxu1  ;;  %v1028_v60 = vmul.f32 %v2379_v28, %v1010_v27  ;;  %v1257_v27 = vld [vmem:[%s3750_s8 + $0x10] sm:$0xff] }
 0x106   : > { %v1387_v15 = vpack.c.bf16 %v3153_v20, %v3160_v7  ;;  %v956_v14 = vmul.f32 %v940_v21, %v917_v19  ;;  %v1013_v21 = vld [vmem:[%s3749_s7 + $0x18] sm:$0xff] }
 0x107   : > { %v3175_v23 = vadd.f32 %v957_v16, %v731_v22  ;;  %v1031_v28 = vmul.f32 %v2384_v33, %v1013_v21  ;;  %v1409_v7 = vld [vmem:[%s3753_s11 + $0x18] sm:$0xff] }
 0x108   : > { %v3182_v10 = vadd.f32 %v956_v14, %v730_v6  ;;  %v2501_v61 = vpop.f32.mrb[16].mxu1  ;;  %v1258_v6 = vld [vmem:[%s3750_s8 + $0x18] sm:$0xff] }
 0x109   : > { %v1274_v19 = vmul.f32 %v2501_v61, %v1256_v57  ;;  %v1166_v22 = vpop.f32.mrb[17].mxu1  ;;  %v1030_v61 = vmul.f32 %v2383_v31, %v1012_v30  ;;  %v1259_v31 = vld [vmem:[%s3750_s8 + $0x20] sm:$0xff] }
 0x10a   : > { %v1273_v16 = vmul.f32 %v1255_v24, %v1166_v22  ;;  %v1015_v24 = vld [vmem:[%s3749_s7 + $0x28] sm:$0xff]  ;;  %v3755_v55 = vpack.c.bf16 %v3175_v23, %v3182_v10  ;;  %v1408_v23 = vld [vmem:[%s3753_s11 + $0x10] sm:$0xff] }
 0x10b   : > { %v1292_v26 = vadd.f32 %v1274_v19, %v1029_v25  ;;  %v1014_v25 = vld [vmem:[%s3749_s7 + $0x20] sm:$0xff]  ;;  %v1033_v29 = vmul.f32 %v2388_v36, %v1015_v24  ;;  %v1016_v36 = vld [vmem:[%s3749_s7 + $0x30] sm:$0xff] }
 0x10c   : > { %v1291_v14 = vadd.f32 %v1273_v16, %v1028_v60  ;;  %v2504_v57 = vpop.f32.mrb[18].mxu1  ;;  %v1260_v60 = vld [vmem:[%s3750_s8 + $0x28] sm:$0xff]  ;;  %v1261_v24 = vld [vmem:[%s3750_s8 + $0x30] sm:$0xff] }
 0x10d   : > { %v1276_v22 = vmul.f32 %v2504_v57, %v1258_v6  ;;  %v1176_v18 = vpop.f32.mrb[19].mxu1 }
 0x10e   : > { %v1275_v33 = vmul.f32 %v1257_v27, %v1176_v18  ;;  %v1389_v21 = vpack.c.bf16 %v1292_v26, %v1291_v14  ;;  %v1032_v18 = vmul.f32 %v2387_v34, %v1014_v25  ;;  %v1017_v26 = vld [vmem:[%s3749_s7 + $0x38] sm:$0xff] }
 0x10f   : > { %v1294_v19 = vadd.f32 %v1276_v22, %v1031_v28 }
 0x110   : > { %v1293_v30 = vadd.f32 %v1275_v33, %v1030_v61  ;;  %v1463_v16 = vsel %vm732_vm0, %v1389_v21, 0  ;;  %v2507_v6 = vpop.f32.mrb[20].mxu1  ;;  %v1035_v61 = vmul.f32 %v2392_v39, %v1017_v26  ;;  %v1034_v33 = vmul.f32 %v2391_v37, %v1016_v36  ;;  %v1019_v21 = vld [vmem:[%s3749_s7 + $0x48] sm:$0xff] }
 0x111   : > { %1490 = vmatpush1.bf16.xpose.msra.mxu0 %v1463_v16  ;;  %v1278_v28 = vmul.f32 %v2507_v6, %v1260_v60  ;;  %v1186_v27 = vpop.f32.mrb[21].mxu1  ;;  %v1264_v16 = vld [vmem:[%s3750_s8 + $0x48] sm:$0xff]  ;;  %v1037_v37 = vmul.f32 %v2396_v42, %v1019_v21  ;;  %v1263_v6 = vld [vmem:[%s3750_s8 + $0x40] sm:$0xff]  ;;  %v1020_v42 = vld [vmem:[%s3749_s7 + $0x50] sm:$0xff] }
 0x112   : > { %v1277_v14 = vmul.f32 %v1259_v31, %v1186_v27  ;;  %1491 = vmatprep.subr.bf16.mxu0 %v2689_v54  ;;  %v1390_v57 = vpack.c.bf16 %v1294_v19, %v1293_v30  ;;  %v1021_v27 = vld [vmem:[%s3749_s7 + $0x58] sm:$0xff] }
 0x113   : > { %v1296_v34 = vadd.f32 %v1278_v28, %v1033_v29  ;;  %v1018_v29 = vld [vmem:[%s3749_s7 + $0x40] sm:$0xff] }
 0x114   : > { %v1295_v22 = vadd.f32 %v1277_v14, %v1032_v18  ;;  %v2510_v25 = vpop.f32.mrb[22].mxu1  ;;  %v1466_v39 = vsel %vm732_vm0, %v1390_v57, 0  ;;  %v1036_v28 = vmul.f32 %v2395_v40, %v1018_v29 }
 0x115   : > { %v1280_v60 = vmul.f32 %v2510_v25, %v1262_v32  ;;  %v1196_v19 = vpop.f32.mrb[23].mxu1  ;;  %v1038_v25 = vmul.f32 %v2399_v43, %v1020_v42 }
 0x116   : > { %v1279_v31 = vmul.f32 %v1261_v24, %v1196_v19  ;;  %v1391_v30 = vpack.c.bf16 %v1296_v34, %v1295_v22  ;;  %v1039_v34 = vmul.f32 %v2400_v45, %v1021_v27  ;;  %v1022_v19 = vld [vmem:[%s3749_s7 + $0x60] sm:$0xff] }
 0x117   : > { %v1298_v35 = vadd.f32 %v1280_v60, %v1035_v61  ;;  %v1265_v61 = vld [vmem:[%s3750_s8 + $0x50] sm:$0xff] }
 0x118   : > { %v1297_v18 = vadd.f32 %v1279_v31, %v1034_v33  ;;  %v2513_v26 = vpop.f32.mrb[24].mxu1  ;;  %v1023_v33 = vld [vmem:[%s3749_s7 + $0x68] sm:$0xff]  ;;  %v1469_v45 = vsel %vm732_vm0, %v1391_v30, 0  ;;  %v1025_v30 = vld [vmem:[%s3749_s7 + $0x78] sm:$0xff] }
 0x119   : > { %1492 = vmatpush1.bf16.xpose.msra.mxu0 %v1466_v39  ;;  %v1282_v36 = vmul.f32 %v2513_v26, %v1264_v16  ;;  %v1206_v14 = vpop.f32.mrb[25].mxu1  ;;  %v1268_v31 = vld [vmem:[%s3750_s8 + $0x68] sm:$0xff]  ;;  %v1041_v43 = vmul.f32 %v2404_v48, %v1023_v33  ;;  %v1267_v16 = vld [vmem:[%s3750_s8 + $0x60] sm:$0xff]  ;;  %v1024_v48 = vld [vmem:[%s3749_s7 + $0x70] sm:$0xff] }
 0x11a   : > { %1493 = vmatprep.subr.bf16.mxu0 %v2689_v54  ;;  %v1281_v57 = vmul.f32 %v1263_v6, %v1206_v14  ;;  %v1392_v32 = vpack.c.bf16 %v1298_v35, %v1297_v18  ;;  %v1040_v6 = vmul.f32 %v2403_v46, %v1022_v19  ;;  %v1269_v14 = vld [vmem:[%s3750_s8 + $0x70] sm:$0xff]  ;;  %v1272_v33 = vld [vmem:[%s3750_s8 + $0x88] sm:$0xff] }
 0x11b   : > { %v1300_v40 = vadd.f32 %v1282_v36, %v1037_v37  ;;  %v1043_v36 = vmul.f32 %v2408_v51, %v1025_v30 }
 0x11c   : > { %v1299_v24 = vadd.f32 %v1281_v57, %v1036_v28  ;;  %v2516_v22 = vpop.f32.mrb[26].mxu1  ;;  %v1472_v51 = vsel %vm732_vm0, %v1392_v32, 0 }
 0x11d   : > { %v1284_v21 = vmul.f32 %v2516_v22, %v1266_v38  ;;  %v1216_v60 = vpop.f32.mrb[27].mxu1  ;;  %v1042_v38 = vmul.f32 %v2407_v49, %v1024_v48 }
 0x11e   : > { %v1283_v29 = vmul.f32 %v1265_v61, %v1216_v60  ;;  %v1393_v39 = vpack.c.bf16 %v1300_v40, %v1299_v24  ;;  %v1027_v40 = vld [vmem:[%s3749_s7 + $0x88] sm:$0xff]  ;;  %v1026_v24 = vld [vmem:[%s3749_s7 + $0x80] sm:$0xff] }
 0x11f   : > { %v1302_v41 = vadd.f32 %v1284_v21, %v1039_v34  ;;  %v1045_v49 = vmul.f32 %v2412_v53, %v1027_v40  ;;  %v1271_v21 = vld [vmem:[%s3750_s8 + $0x80] sm:$0xff] }
 0x120   : > { %v1301_v35 = vadd.f32 %v1283_v29, %v1038_v25  ;;  %v2519_v37 = vpop.f32.mrb[28].mxu1  ;;  %v1475_v53 = vsel %vm732_vm0, %v1393_v39, 0 }
 0x121   : > { %1494 = vmatpush1.bf16.xpose.msra.mxu0 %v1469_v45  ;;  %v1286_v18 = vmul.f32 %v2519_v37, %v1268_v31  ;;  %v1226_v26 = vpop.f32.mrb[29].mxu1  ;;  %v1044_v45 = vmul.f32 %v2411_v52, %v1026_v24  ;;  %v1412_v24 = vld [vmem:[%s3753_s11 + $0x30] sm:$0xff] }
 0x122   : > { %1495 = vmatprep.subr.bf16.mxu0 %v2689_v54  ;;  %v1285_v28 = vmul.f32 %v1267_v16, %v1226_v26  ;;  %v1394_v27 = vpack.c.bf16 %v1302_v41, %v1301_v35 }
 0x123   : > { %v1304_v46 = vadd.f32 %v1286_v18, %v1041_v43 }
 0x124   : > { %v1303_v42 = vadd.f32 %v1285_v28, %v1040_v6  ;;  %v2522_v57 = vpop.f32.mrb[30].mxu1  ;;  %v1478_v37 = vsel %vm732_vm0, %v1394_v27, 0  ;;  %v1410_v27 = vld [vmem:[%s3753_s11 + $0x20] sm:$0xff] }
 0x125   : > { %v1288_v34 = vmul.f32 %v2522_v57, %v1270_v44  ;;  %v1236_v61 = vpop.f32.mrb[31].mxu1 }
 0x126   : > { %v1287_v22 = vmul.f32 %v1269_v14, %v1236_v61  ;;  %v1395_v25 = vpack.c.bf16 %v1304_v46, %v1303_v42  ;;  %v1411_v46 = vld [vmem:[%s3753_s11 + $0x28] sm:$0xff] }
 0x127   : > { %v1306_v47 = vadd.f32 %v1288_v34, %v1043_v36  ;;  %v1413_v34 = vld [vmem:[%s3753_s11 + $0x38] sm:$0xff] }
 0x128   : > { %v1305_v60 = vadd.f32 %v1287_v22, %v1042_v38  ;;  %v2525_v19 = vpop.f32.mrb[32].mxu1  ;;  %v1481_v50 = vsel %vm732_vm0, %v1395_v25, 0 }
 0x129   : > { %1496 = vmatpush1.bf16.xpose.msra.mxu0 %v1472_v51  ;;  %v1290_v32 = vmul.f32 %v2525_v19, %v1272_v33  ;;  %v1246_v29 = vpop.f32.mrb[33].mxu1  ;;  %v1414_v19 = vld [vmem:[%s3753_s11 + $0x40] sm:$0xff] }
 0x12a   : > { %1497 = vmatprep.subr.bf16.mxu0 %v2689_v54  ;;  %v1289_v31 = vmul.f32 %v1271_v21, %v1246_v29  ;;  %v1396_v41 = vpack.c.bf16 %v1306_v47, %v1305_v60 }
 0x12b   : > { %v1308_v43 = vadd.f32 %v1290_v32, %v1045_v49  ;;  %v1415_v32 = vld [vmem:[%s3753_s11 + $0x48] sm:$0xff] }
 0x12c   : > { %v1307_v16 = vadd.f32 %v1289_v31, %v1044_v45  ;;  %v1484_v52 = vsel %vm732_vm0, %v1396_v41, 0  ;;  %v1416_v41 = vld [vmem:[%s3753_s11 + $0x50] sm:$0xff] }
 0x12e   : > { %v1397_v35 = vpack.c.bf16 %v1308_v43, %v1307_v16 }
 0x130   : > { %v1487_v39 = vsel %vm732_vm0, %v1397_v35, 0 }
 0x131   : > { %1498 = vmatpush1.bf16.xpose.msra.mxu0 %v1475_v53 }
 0x132   : > { %1499 = vmatprep.subr.bf16.mxu0 %v2689_v54 }
 0x139   : > { %1500 = vmatpush1.bf16.xpose.msra.mxu0 %v1478_v37  ;;  %v1417_v37 = vld [vmem:[%s3753_s11 + $0x58] sm:$0xff] }
 0x13a   : > { %1501 = vmatprep.subr.bf16.mxu0 %v2689_v54 }
 0x141   : > { %1502 = vmatpush1.bf16.xpose.msra.mxu0 %v1481_v50 }
 0x142   : > { %1503 = vmatprep.subr.bf16.mxu0 %v2689_v54 }
 0x149   : > { %1504 = vmatpush1.bf16.xpose.msra.mxu0 %v1484_v52 }
 0x14a   : > { %1505 = vmatprep.subr.bf16.mxu0 %v2689_v54 }
 0x151   : > { %1506 = vmatpush1.bf16.xpose.msra.mxu0 %v1487_v39 }
 0x158   : > { %2321 = vmatmul.mubr.msk.bf16.vlgmr.msra.gmra.mrb[0].mxu0 %vm732_vm0, %v1381_v62  ;;  %v2561_v62 = vld [vmem:[%s2810_s17 + $0x200] sm:$0xff]  }
 0x159   : > { %1531 = vmatprep.mubr.bf16.mxu0 %v2689_v54  ;;  %1912 = vmatpush1.bf16.msra.mxu1 %v2561_v62 }
 0x15a   : > { %1913 = vmatprep.subr.bf16.mxu1 %v2689_v54 }
 0x15d   : > { %1914 = vmatpush1.bf16.msra.mxu1 %v2562_v4 }
 0x15e   : > { %1915 = vmatprep.subr.bf16.mxu1 %v2689_v54 }
 0x160   : > { %2322 = vmatmul.mubr.msk.bf16.gmra.mrb[4].mxu0 %vm732_vm0, %v1382_v59  ;;  %v1398_v59 = vld [vmem:[%s3752_s10] sm:$0x3] }
 0x161   : > { %1541 = vmatprep.mubr.bf16.mxu0 %v2689_v54  ;;  %1916 = vmatpush1.bf16.msra.mxu1 %v2563_v2  ;;  %vm1402_vm1 = vcmp.lt.s32.totalorder %v1398_v59, 0  ;;  %vm1403_vm2 = vcmp.ge.s32.totalorder %v1398_v59, 3 }
 0x162   : > { %1917 = vmatprep.subr.bf16.mxu1 %v2689_v54  ;;  %vm1404_vm3 = vmor %vm1402_vm1, %vm1403_vm2 }
 0x163   : > { %v1405_v0 = vsel %vm1404_vm3, -1.7014117e+38, %v2690_v11  ;;  %v1419_v11 = vld [vmem:[%s3753_s11 + $0x68] sm:$0xff] }
 0x168   : > { %2323 = vmatmul.mubr.msk.bf16.gmra.mrb[8].mxu0 %vm732_vm0, %v1383_v5  ;;  %v1609_v5 = vsub.s32 1, %v1604_v63 }
 0x169   : > { %1551 = vmatprep.mubr.bf16.mxu0 %v2689_v54 }
 0x16a   : > { %v3392_v17 = vrot.slane %v1405_v0, %v1609_v5 }
 0x170   : > { %2324 = vmatmul.mubr.msk.bf16.gmra.mrb[12].mxu0 %vm732_vm0, %v1384_v1  ;;  %v1605_v1 = vsub.s32 0, %v1604_v63 }
 0x171   : > { %1561 = vmatprep.mubr.bf16.mxu0 %v2689_v54 }
 0x172   : > { %v3394_v20 = vrot.slane %v1405_v0, %v1605_v1 }
 0x178   : > { %2325 = vmatmul.mubr.msk.bf16.gmra.mrb[16].mxu0 %vm732_vm0, %v1385_v9 }
 0x179   : > { %1571 = vmatprep.mubr.bf16.mxu0 %v2689_v54 }
 0x180   : > { %2326 = vmatmul.mubr.msk.bf16.gmra.mrb[20].mxu0 %vm732_vm0, %v1386_v12 }
 0x181   : > { %1581 = vmatprep.mubr.bf16.mxu0 %v2689_v54 }
 0x188   : > { %2327 = vmatmul.mubr.msk.bf16.gmra.mrb[24].mxu0 %vm732_vm0, %v1387_v15 }
 0x189   : > { %1591 = vmatprep.mubr.bf16.mxu0 %v2689_v54 }
 0x190   : > { %2328 = vmatmul.mubr.msk.bf16.gmra.mrb[28].mxu0 %vm732_vm0, %v3755_v55 }
 0x22b   : > { %v1523_v9 = vpop.f32.mrb[0].mxu0 }
 0x22c   : > { %v1524_v3 = vadd.f32 %v1523_v9, %v1406_v13  ;;  %v1525_v12 = vpop.f32.mrb[1].mxu0  ;;  %v1420_v13 = vld [vmem:[%s3753_s11 + $0x70] sm:$0xff] }
 0x22d   : > { %v1526_v15 = vadd.f32 %v1525_v12, %v1407_v58  ;;  %v1527_v10 = vpop.f32.mrb[2].mxu0  ;;  %v1421_v12 = vld [vmem:[%s3753_s11 + $0x78] sm:$0xff] }
 0x22e   : > { %v1529_v6 = vpop.f32.mrb[3].mxu0  ;;  %v1528_v26 = vadd.f32 %v1527_v10, %v1408_v23  ;;  %v3406_v48 = vadd.f32 %v3394_v20, %v1524_v3 }
 0x22f   : > { %v3403_v30 = vadd.f32 %v3392_v17, %v1526_v15  ;;  %v1530_v18 = vadd.f32 %v1529_v6, %v1409_v7  ;;  %v2564_v15 = vld [vmem:[%s2810_s17 + $0x218] sm:$0xff]  }
 0x230   : > { %v3423_v57 = vadd.f32 %v3394_v20, %v1528_v26  ;;  %1918 = vmatpush1.bf16.msra.mxu1 %v2564_v15 }
 0x231   : > { %v3409_v28 = vadd.f32 %v3392_v17, %v1530_v18  ;;  %v1645_v44 = vsel %vm732_vm0, %v3403_v30, -inf  ;;  %1919 = vmatprep.subr.bf16.mxu1 %v2689_v54 }
 0x232   : > { %v1646_v36 = vmax.f32 %v3406_v48, %v1645_v44 }
 0x233   : > { %v1533_v14 = vpop.f32.mrb[4].mxu0  ;;  %v1649_v42 = vsel %vm732_vm0, %v3409_v28, -inf }
 0x234   : > { %v1534_v38 = vadd.f32 %v1533_v14, %v1410_v27  ;;  %v1535_v40 = vpop.f32.mrb[5].mxu0  ;;  %1647 = vmax.xlane.f32.xlu0 %v1646_v36  ;;  %v1650_v25 = vmax.f32 %v3423_v57, %v1649_v42  ;;  %v1422_v14 = vld [vmem:[%s3753_s11 + $0x80] sm:$0xff] }
 0x235   : > { %v1536_v61 = vadd.f32 %v1535_v40, %v1411_v46  ;;  %v1537_v51 = vpop.f32.mrb[6].mxu0  ;;  %v2565_v46 = vld [vmem:[%s2810_s17 + $0x220] sm:$0xff]   ;;  %v1423_v40 = vld [vmem:[%s3753_s11 + $0x88] sm:$0xff] }
 0x236   : > { %v1539_v22 = vpop.f32.mrb[7].mxu0  ;;  %v1538_v49 = vadd.f32 %v1537_v51, %v1412_v24  ;;  %v3436_v21 = vadd.f32 %v3394_v20, %v1534_v38  ;;  %1920 = vmatpush1.bf16.msra.mxu1 %v2565_v46  ;;  %v1424_v24 = vld [vmem:[%s3753_s11 + $0x90] sm:$0xff]  ;;  %v1431_v46 = vld [vmem:[%s3753_s11 + $0xc8] sm:$0xff] }
 0x237   : > { %v3433_v33 = vadd.f32 %v3392_v17, %v1536_v61  ;;  %v1540_v47 = vadd.f32 %v1539_v22, %v1413_v34  ;;  %1921 = vmatprep.subr.bf16.mxu1 %v2689_v54 }
 0x238   : > { %1651 = vmax.xlane.f32.xlu0 %v1650_v25  ;;  %v3456_v16 = vadd.f32 %v3394_v20, %v1538_v49 }
 0x239   : > { %v3439_v60 = vadd.f32 %v3392_v17, %v1540_v47  ;;  %v1653_v45 = vsel %vm732_vm0, %v3433_v33, -inf  ;;  %v1425_v47 = vld [vmem:[%s3753_s11 + $0x98] sm:$0xff] }
 0x23a   : > { %v1654_v29 = vmax.f32 %v3436_v21, %v1653_v45 }
 0x23b   : > { %v1543_v31 = vpop.f32.mrb[8].mxu0  ;;  %v1657_v43 = vsel %vm732_vm0, %v3439_v60, -inf }
 0x23c   : > { %v1544_v53 = vadd.f32 %v1543_v31, %v1414_v19  ;;  %v1545_v35 = vpop.f32.mrb[9].mxu0  ;;  %1655 = vmax.xlane.f32.xlu1 %v1654_v29  ;;  %v1658_v56 = vmax.f32 %v3456_v16, %v1657_v43  ;;  %v2566_v19 = vld [vmem:[%s2810_s17 + $0x228] sm:$0xff]  }
 0x23d   : > { %v1546_v50 = vadd.f32 %v1545_v35, %v1415_v32  ;;  %v1547_v52 = vpop.f32.mrb[10].mxu0  ;;  %1922 = vmatpush1.bf16.msra.mxu1 %v2566_v19  ;;  %v2567_v35 = vld [vmem:[%s2810_s17 + $0x230] sm:$0xff]  }
 0x23e   : > { %v1548_v39 = vadd.f32 %v1547_v52, %v1416_v41  ;;  %v1549_v55 = vpop.f32.mrb[11].mxu0  ;;  %v3466_v2 = vadd.f32 %v3394_v20, %v1544_v53  ;;  %1923 = vmatprep.subr.bf16.mxu1 %v2689_v54 }
 0x23f   : > { %v3463_v62 = vadd.f32 %v3392_v17, %v1546_v50  ;;  %v1550_v4 = vadd.f32 %v1549_v55, %v1417_v37  ;;  %v1426_v50 = vld [vmem:[%s3753_s11 + $0xa0] sm:$0xff]  ;;  %v1427_v55 = vld [vmem:[%s3753_s11 + $0xa8] sm:$0xff] }
 0x240   : > { %1659 = vmax.xlane.f32.xlu1 %v1658_v56  ;;  %v3477_v5 = vadd.f32 %v3394_v20, %v1548_v39 }
 0x241   : > { %v3469_v59 = vadd.f32 %v3392_v17, %v1550_v4  ;;  %v1661_v63 = vsel %vm732_vm0, %v3463_v62, -inf  ;;  %1924 = vmatpush1.bf16.msra.mxu1 %v2567_v35 }
 0x242   : > { %v1662_v0 = vmax.f32 %v3466_v2, %v1661_v63  ;;  %1925 = vmatprep.subr.bf16.mxu1 %v2689_v54 }
 0x243   : > { %v1553_v1 = vpop.f32.mrb[12].mxu0  ;;  %v1665_v58 = vsel %vm732_vm0, %v3469_v59, -inf }
 0x244   : > { %v1554_v9 = vadd.f32 %v1553_v1, %v1418_v8  ;;  %v1555_v3 = vpop.f32.mrb[13].mxu0  ;;  %1663 = vmax.xlane.f32.xlu0 %v1662_v0  ;;  %v1666_v7 = vmax.f32 %v3477_v5, %v1665_v58  ;;  %v1428_v8 = vld [vmem:[%s3753_s11 + $0xb0] sm:$0xff]  ;;  %v1429_v1 = vld [vmem:[%s3753_s11 + $0xb8] sm:$0xff] }
 0x245   : > { %v1556_v23 = vadd.f32 %v1555_v3, %v1419_v11  ;;  %v1557_v10 = vpop.f32.mrb[14].mxu0  ;;  %v2568_v58 = vld [vmem:[%s2810_s17 + $0x238] sm:$0xff]   ;;  %s2344_s17 = sshll.u32 %s3761_s21, 7 }
 0x246   : > { %v1558_v6 = vadd.f32 %v1557_v10, %v1420_v13  ;;  %v1559_v18 = vpop.f32.mrb[15].mxu0  ;;  %1667 = vmax.xlane.f32.xlu1 %v1666_v7  ;;  %v3498_v44 = vadd.f32 %v3394_v20, %v1554_v9  ;;  %1926 = vmatpush1.bf16.msra.mxu1 %v2568_v58  ;;  %s3699_s29 = scalar_lea.vmem %s3754_s12, %s2344_s17 }
 0x247   : > { %v3494_v26 = vadd.f32 %v3392_v17, %v1556_v23  ;;  %v1560_v27 = vadd.f32 %v1559_v18, %v1421_v12 }
 0x248   : > { %v3510_v38 = vadd.f32 %v3394_v20, %v1558_v6  ;;  %v1430_v6 = vld [vmem:[%s3753_s11 + $0xc0] sm:$0xff] }
 0x249   : > { %v3502_v36 = vadd.f32 %v3392_v17, %v1560_v27  ;;  %v1669_v42 = vsel %vm732_vm0, %v3494_v26, -inf }
 0x24a   : > { %v1670_v34 = vmax.f32 %v3498_v44, %v1669_v42 }
 0x24b   : > { %v1563_v61 = vpop.f32.mrb[16].mxu0  ;;  %v1673_v51 = vsel %vm732_vm0, %v3502_v36, -inf }
 0x24c   : > { %v1564_v22 = vadd.f32 %v1563_v61, %v1422_v14  ;;  %v1565_v25 = vpop.f32.mrb[17].mxu0  ;;  %1671 = vmax.xlane.f32.xlu0 %v1670_v34  ;;  %v1674_v49 = vmax.f32 %v3510_v38, %v1673_v51  ;;  %v1433_v51 = vld [vmem:[%s3753_s11 + $0xd8] sm:$0xff] }
 0x24d   : > { %v1566_v45 = vadd.f32 %v1565_v25, %v1423_v40  ;;  %v1567_v32 = vpop.f32.mrb[18].mxu0  ;;  %v1432_v40 = vld [vmem:[%s3753_s11 + $0xd0] sm:$0xff] }
 0x24e   : > { %v1568_v29 = vadd.f32 %v1567_v32, %v1424_v24  ;;  %v1569_v31 = vpop.f32.mrb[19].mxu0  ;;  %1675 = vmax.xlane.f32.xlu1 %v1674_v49  ;;  %v3532_v53 = vadd.f32 %v3394_v20, %v1564_v22 }
 0x24f   : > { %v3528_v41 = vadd.f32 %v3392_v17, %v1566_v45  ;;  %v1570_v43 = vadd.f32 %v1569_v31, %v1425_v47 }
 0x250   : > { %v3544_v39 = vadd.f32 %v3394_v20, %v1568_v29 }
 0x251   : > { %v3536_v37 = vadd.f32 %v3392_v17, %v1570_v43  ;;  %v1677_v52 = vsel %vm732_vm0, %v3528_v41, -inf  ;;  %v1434_v43 = vld [vmem:[%s3753_s11 + $0xe0] sm:$0xff] }
 0x252   : > { %v1678_v56 = vmax.f32 %v3532_v53, %v1677_v52  ;;  %v1435_v52 = vld [vmem:[%s3753_s11 + $0xe8] sm:$0xff] }
 0x253   : > { %v1573_v4 = vpop.f32.mrb[20].mxu0  ;;  %v1681_v63 = vsel %vm732_vm0, %v3536_v37, -inf }
 0x254   : > { %v1574_v11 = vadd.f32 %v1573_v4, %v1426_v50  ;;  %v1575_v0 = vpop.f32.mrb[21].mxu0  ;;  %1679 = vmax.xlane.f32.xlu0 %v1678_v56  ;;  %v1682_v13 = vmax.f32 %v3544_v39, %v1681_v63  ;;  %v1436_v4 = vld [vmem:[%s3753_s11 + $0xf0] sm:$0xff] }
 0x255   : > { %v1576_v9 = vadd.f32 %v1575_v0, %v1427_v55  ;;  %v1577_v3 = vpop.f32.mrb[22].mxu0  ;;  %v1437_v0 = vld [vmem:[%s3753_s11 + $0xf8] sm:$0xff] }
 0x256   : > { %v1578_v12 = vadd.f32 %v1577_v3, %v1428_v8  ;;  %v1579_v7 = vpop.f32.mrb[23].mxu0  ;;  %1683 = vmax.xlane.f32.xlu1 %v1682_v13  ;;  %v3565_v23 = vadd.f32 %v3394_v20, %v1574_v11 }
 0x257   : > { %v3562_v15 = vadd.f32 %v3392_v17, %v1576_v9  ;;  %v1580_v54 = vadd.f32 %v1579_v7, %v1429_v1 }
 0x258   : > { %v3576_v27 = vadd.f32 %v3394_v20, %v1578_v12 }
 0x259   : > { %v3568_v10 = vadd.f32 %v3392_v17, %v1580_v54  ;;  %v1685_v18 = vsel %vm732_vm0, %v3562_v15, -inf }
 0x25a   : > { %v1686_v14 = vmax.f32 %v3565_v23, %v1685_v18 }
 0x25b   : > { %v1583_v42 = vpop.f32.mrb[24].mxu0  ;;  %v1689_v34 = vsel %vm732_vm0, %v3568_v10, -inf }
 0x25c   : > { %v1584_v61 = vadd.f32 %v1583_v42, %v1430_v6  ;;  %v1585_v24 = vpop.f32.mrb[25].mxu0  ;;  %1687 = vmax.xlane.f32.xlu0 %v1686_v14  ;;  %v1690_v22 = vmax.f32 %v3576_v27, %v1689_v34 }
 0x25d   : > { %v1586_v25 = vadd.f32 %v1585_v24, %v1431_v46  ;;  %v1587_v47 = vpop.f32.mrb[26].mxu0 }
 0x25e   : > { %v1588_v49 = vadd.f32 %v1587_v47, %v1432_v40  ;;  %v1589_v19 = vpop.f32.mrb[27].mxu0  ;;  %1691 = vmax.xlane.f32.xlu1 %v1690_v22  ;;  %v3595_v29 = vadd.f32 %v3394_v20, %v1584_v61 }
 0x25f   : > { %v3592_v45 = vadd.f32 %v3392_v17, %v1586_v25  ;;  %v1590_v32 = vadd.f32 %v1589_v19, %v1433_v51 }
 0x260   : > { %v3606_v50 = vadd.f32 %v3394_v20, %v1588_v49 }
 0x261   : > { %v3598_v31 = vadd.f32 %v3392_v17, %v1590_v32  ;;  %v1693_v35 = vsel %vm732_vm0, %v3592_v45, -inf }
 0x262   : > { %v1694_v55 = vmax.f32 %v3595_v29, %v1693_v35 }
 0x263   : > { %v1593_v56 = vpop.f32.mrb[28].mxu0  ;;  %v1697_v8 = vsel %vm732_vm0, %v3598_v31, -inf }
 0x264   : > { %v1594_v63 = vadd.f32 %v1593_v56, %v1434_v43  ;;  %v1595_v11 = vpop.f32.mrb[29].mxu0  ;;  %1695 = vmax.xlane.f32.xlu0 %v1694_v55  ;;  %v1698_v1 = vmax.f32 %v3606_v50, %v1697_v8 }
 0x265   : > { %v1596_v13 = vadd.f32 %v1595_v11, %v1435_v52  ;;  %v1597_v58 = vpop.f32.mrb[30].mxu0 }
 0x266   : > { %v1598_v9 = vadd.f32 %v1597_v58, %v1436_v4  ;;  %v1599_v3 = vpop.f32.mrb[31].mxu0  ;;  %1699 = vmax.xlane.f32.xlu1 %v1698_v1  ;;  %v3625_v54 = vadd.f32 %v3394_v20, %v1594_v63 }
 0x267   : > { %v3622_v12 = vadd.f32 %v3392_v17, %v1596_v13  ;;  %v1600_v7 = vadd.f32 %v1599_v3, %v1437_v0 }
 0x268   : > { %v3633_v46 = vadd.f32 %v3394_v20, %v1598_v9 }
 0x269   : > { %v3628_v6 = vadd.f32 %v3392_v17, %v1600_v7  ;;  %v1701_v18 = vsel %vm732_vm0, %v3622_v12, -inf }
 0x26a   : > { %v1702_v14 = vmax.f32 %v3625_v54, %v1701_v18 }
 0x26b   : > { %v1705_v42 = vsel %vm732_vm0, %v3628_v6, -inf }
 0x26c   : > { %1703 = vmax.xlane.f32.xlu0 %v1702_v14  ;;  %v1706_v40 = vmax.f32 %v3633_v46, %v1705_v42 }
 0x26e   : > { %1707 = vmax.xlane.f32.xlu1 %v1706_v40 }
 0x2c1   : > { %v1648_v34 = vpop.xlane.xlu0 %1647 }
 0x2c2   : > { %v1709_v61 = vsub.f32 %v3406_v48, %v1648_v34  ;;  %v1710_v17 = vsub.f32 %v3403_v30, %v1648_v34 }
 0x2c4   : > { %v1741_v24 = vmul.f32 1.442695, %v1709_v61  ;;  %v1743_v51 = vmul.f32 1.442695, %v1710_v17 }
 0x2c5   : > { %v1652_v22 = vpop.xlane.xlu0 %1651 }
 0x2c6   : > { %2569 = vpow2.f32 %v1741_v24  ;;  %v1711_v20 = vsub.f32 %v3423_v57, %v1652_v22  ;;  %v1712_v25 = vsub.f32 %v3409_v28, %v1652_v22 }
 0x2c7   : > { %2571 = vpow2.f32 %v1743_v51 }
 0x2c8   : > { %v1745_v47 = vmul.f32 1.442695, %v1711_v20  ;;  %v1747_v49 = vmul.f32 1.442695, %v1712_v25 }
 0x2c9   : > { %v1656_v19 = vpop.xlane.xlu1 %1655 }
 0x2ca   : > { %2573 = vpow2.f32 %v1745_v47  ;;  %v1713_v32 = vsub.f32 %v3436_v21, %v1656_v19  ;;  %v1714_v43 = vsub.f32 %v3433_v33, %v1656_v19 }
 0x2cb   : > { %2575 = vpow2.f32 %v1747_v49 }
 0x2cc   : > { %v1749_v48 = vmul.f32 1.442695, %v1713_v32  ;;  %v1751_v30 = vmul.f32 1.442695, %v1714_v43 }
 0x2cd   : > { %v1660_v35 = vpop.xlane.xlu1 %1659 }
 0x2ce   : > { %2577 = vpow2.f32 %v1749_v48  ;;  %v1715_v52 = vsub.f32 %v3456_v16, %v1660_v35  ;;  %v1716_v57 = vsub.f32 %v3439_v60, %v1660_v35 }
 0x2cf   : > { %2579 = vpow2.f32 %v1751_v30 }
 0x2d0   : > { %v2570_v28 = vpop.eup %2569  ;;  %v1753_v55 = vmul.f32 1.442695, %v1715_v52  ;;  %v1755_v56 = vmul.f32 1.442695, %v1716_v57 }
 0x2d1   : > { %v2572_v4 = vpop.eup %2571  ;;  %v1664_v8 = vpop.xlane.xlu0 %1663 }
 0x2d2   : > { %2581 = vpow2.f32 %v1753_v55  ;;  %v1717_v21 = vsub.f32 %v3466_v2, %v1664_v8  ;;  %v1718_v33 = vsub.f32 %v3463_v62, %v1664_v8  ;;  %v1805_v63 = vsel %vm732_vm0, %v2572_v4, 0.0 }
 0x2d3   : > { %2583 = vpow2.f32 %v1755_v56  ;;  %v1668_v11 = vpop.xlane.xlu1 %1667  ;;  %v1806_v0 = vadd.f32 %v2570_v28, %v1805_v63 }
 0x2d4   : > { %v2574_v1 = vpop.eup %2573  ;;  %v1757_v16 = vmul.f32 1.442695, %v1717_v21  ;;  %v1759_v13 = vmul.f32 1.442695, %v1718_v33  ;;  %v1719_v60 = vsub.f32 %v3477_v5, %v1668_v11  ;;  %v1720_v58 = vsub.f32 %v3469_v59, %v1668_v11 }
 0x2d5   : > { %v2576_v9 = vpop.eup %2575  ;;  %1807 = vadd.xlane.f32.xlu0 %v1806_v0  ;;  %v1869_v3 = vpack.c.bf16 %v2574_v1, %v2570_v28 }
 0x2d6   : > { %2585 = vpow2.f32 %v1757_v16  ;;  %v1761_v7 = vmul.f32 1.442695, %v1719_v60  ;;  %v1763_v2 = vmul.f32 1.442695, %v1720_v58  ;;  %v1870_v18 = vpack.c.bf16 %v2576_v9, %v2572_v4 }
 0x2d7   : > { %2587 = vpow2.f32 %v1759_v13  ;;  %v1809_v62 = vsel %vm732_vm0, %v2576_v9, 0.0 }
 0x2d8   : > { %v2578_v14 = vpop.eup %2577  ;;  %2589 = vpow2.f32 %v1761_v7  ;;  %2329 = vmatprep.mubr.msk.bf16.mxu1 %vm732_vm0, %v1870_v18  ;;  %v1810_v42 = vadd.f32 %v2574_v1, %v1809_v62 }
 0x2d9   : > { %v2580_v40 = vpop.eup %2579  ;;  %2591 = vpow2.f32 %v1763_v2  ;;  %1942 = vmatmul.mubr.bf16.vlgmr.msra.gmra.mrb[36].mxu1 %v1869_v3  ;;  %v1672_v5 = vpop.xlane.xlu0 %1671 }
 0x2da   : > { %1811 = vadd.xlane.f32.xlu1 %v1810_v42  ;;  %v1721_v59 = vsub.f32 %v3498_v44, %v1672_v5  ;;  %v1722_v34 = vsub.f32 %v3494_v26, %v1672_v5  ;;  %v1813_v61 = vsel %vm732_vm0, %v2580_v40, 0.0 }
 0x2db   : > { %v1676_v17 = vpop.xlane.xlu1 %1675  ;;  %v1814_v24 = vadd.f32 %v2578_v14, %v1813_v61 }
 0x2dc   : > { %v2582_v51 = vpop.eup %2581  ;;  %v1765_v22 = vmul.f32 1.442695, %v1721_v59  ;;  %v1767_v20 = vmul.f32 1.442695, %v1722_v34  ;;  %v1723_v25 = vsub.f32 %v3510_v38, %v1676_v17  ;;  %v1724_v47 = vsub.f32 %v3502_v36, %v1676_v17 }
 0x2dd   : > { %v2584_v49 = vpop.eup %2583  ;;  %1815 = vadd.xlane.f32.xlu0 %v1814_v24  ;;  %v1871_v19 = vpack.c.bf16 %v2582_v51, %v2578_v14 }
 0x2de   : > { %2593 = vpow2.f32 %v1765_v22  ;;  %v1769_v32 = vmul.f32 1.442695, %v1723_v25  ;;  %v1771_v43 = vmul.f32 1.442695, %v1724_v47  ;;  %v1872_v44 = vpack.c.bf16 %v2584_v49, %v2580_v40 }
 0x2df   : > { %2595 = vpow2.f32 %v1767_v20  ;;  %v1817_v26 = vsel %vm732_vm0, %v2584_v49, 0.0 }
 0x2e0   : > { %v2586_v48 = vpop.eup %2585  ;;  %2597 = vpow2.f32 %v1769_v32  ;;  %2330 = vmatprep.mubr.msk.bf16.mxu1 %vm732_vm0, %v1872_v44  ;;  %v1818_v30 = vadd.f32 %v2582_v51, %v1817_v26 }
 0x2e1   : > { %v2588_v35 = vpop.eup %2587  ;;  %2599 = vpow2.f32 %v1771_v43  ;;  %1950 = vmatmul.mubr.bf16.gmra.mrb[40].mxu1 %v1871_v19  ;;  %v1680_v38 = vpop.xlane.xlu0 %1679 }
 0x2e2   : > { %v2590_v36 = vpop.eup %2589  ;;  %1819 = vadd.xlane.f32.xlu1 %v1818_v30  ;;  %v1725_v52 = vsub.f32 %v3532_v53, %v1680_v38  ;;  %v1726_v57 = vsub.f32 %v3528_v41, %v1680_v38  ;;  %v1821_v28 = vsel %vm732_vm0, %v2588_v35, 0.0 }
 0x2e3   : > { %v2592_v55 = vpop.eup %2591  ;;  %v1684_v56 = vpop.xlane.xlu1 %1683  ;;  %v1822_v4 = vadd.f32 %v2586_v48, %v1821_v28  ;;  %v1873_v41 = vpack.c.bf16 %v2590_v36, %v2586_v48 }
 0x2e4   : > { %v1773_v8 = vmul.f32 1.442695, %v1725_v52  ;;  %v1775_v21 = vmul.f32 1.442695, %v1726_v57  ;;  %v1727_v33 = vsub.f32 %v3544_v39, %v1684_v56  ;;  %v1728_v63 = vsub.f32 %v3536_v37, %v1684_v56 }
 0x2e5   : > { %1823 = vadd.xlane.f32.xlu0 %v1822_v4  ;;  %v1874_v11 = vpack.c.bf16 %v2592_v55, %v2588_v35  ;;  %v1825_v0 = vsel %vm732_vm0, %v2592_v55, 0.0 }
 0x2e6   : > { %2601 = vpow2.f32 %v1773_v8  ;;  %v1777_v1 = vmul.f32 1.442695, %v1727_v33  ;;  %v1779_v53 = vmul.f32 1.442695, %v1728_v63  ;;  %v1826_v16 = vadd.f32 %v2590_v36, %v1825_v0 }
 0x2e7   : > { %2603 = vpow2.f32 %v1775_v21  ;;  %2331 = vmatprep.mubr.msk.bf16.mxu1 %vm732_vm0, %v1874_v11 }
 0x2e8   : > { %v2594_v13 = vpop.eup %2593  ;;  %2605 = vpow2.f32 %v1777_v1  ;;  %1827 = vadd.xlane.f32.xlu1 %v1826_v16 }
 0x2e9   : > { %v2596_v60 = vpop.eup %2595  ;;  %2607 = vpow2.f32 %v1779_v53  ;;  %1958 = vmatmul.mubr.bf16.gmra.mrb[44].mxu1 %v1873_v41  ;;  %v1688_v39 = vpop.xlane.xlu0 %1687 }
 0x2ea   : > { %v2598_v37 = vpop.eup %2597  ;;  %v1729_v58 = vsub.f32 %v3565_v23, %v1688_v39  ;;  %v1730_v9 = vsub.f32 %v3562_v15, %v1688_v39  ;;  %v1829_v3 = vsel %vm732_vm0, %v2596_v60, 0.0 }
 0x2eb   : > { %v2600_v7 = vpop.eup %2599  ;;  %v1692_v2 = vpop.xlane.xlu1 %1691  ;;  %v1830_v18 = vadd.f32 %v2594_v13, %v1829_v3  ;;  %v1875_v15 = vpack.c.bf16 %v2598_v37, %v2594_v13 }
 0x2ec   : > { %v1781_v62 = vmul.f32 1.442695, %v1729_v58  ;;  %v1783_v14 = vmul.f32 1.442695, %v1730_v9  ;;  %v1731_v42 = vsub.f32 %v3576_v27, %v1692_v2  ;;  %v1732_v40 = vsub.f32 %v3568_v10, %v1692_v2 }
 0x2ed   : > { %1831 = vadd.xlane.f32.xlu0 %v1830_v18  ;;  %v1876_v5 = vpack.c.bf16 %v2600_v7, %v2596_v60  ;;  %v1833_v59 = vsel %vm732_vm0, %v2600_v7, 0.0 }
 0x2ee   : > { %2609 = vpow2.f32 %v1781_v62  ;;  %v1785_v34 = vmul.f32 1.442695, %v1731_v42  ;;  %v1787_v23 = vmul.f32 1.442695, %v1732_v40  ;;  %v1834_v61 = vadd.f32 %v2598_v37, %v1833_v59 }
 0x2ef   : > { %2611 = vpow2.f32 %v1783_v14  ;;  %2332 = vmatprep.mubr.msk.bf16.mxu1 %vm732_vm0, %v1876_v5 }
 0x2f0   : > { %v2602_v17 = vpop.eup %2601  ;;  %2613 = vpow2.f32 %v1785_v34  ;;  %1835 = vadd.xlane.f32.xlu1 %v1834_v61 }
 0x2f1   : > { %v2604_v24 = vpop.eup %2603  ;;  %2615 = vpow2.f32 %v1787_v23  ;;  %1966 = vmatmul.mubr.bf16.gmra.mrb[48].mxu1 %v1875_v15  ;;  %v1696_v27 = vpop.xlane.xlu0 %1695 }
 0x2f2   : > { %v2606_v10 = vpop.eup %2605  ;;  %v1733_v51 = vsub.f32 %v3595_v29, %v1696_v27  ;;  %v1734_v22 = vsub.f32 %v3592_v45, %v1696_v27  ;;  %v1837_v20 = vsel %vm732_vm0, %v2604_v24, 0.0 }
 0x2f3   : > { %v2608_v25 = vpop.eup %2607  ;;  %v1700_v47 = vpop.xlane.xlu1 %1699  ;;  %v1838_v49 = vadd.f32 %v2602_v17, %v1837_v20  ;;  %v1877_v45 = vpack.c.bf16 %v2606_v10, %v2602_v17 }
 0x2f4   : > { %v1789_v19 = vmul.f32 1.442695, %v1733_v51  ;;  %v1791_v32 = vmul.f32 1.442695, %v1734_v22  ;;  %v1735_v43 = vsub.f32 %v3606_v50, %v1700_v47  ;;  %v1736_v44 = vsub.f32 %v3598_v31, %v1700_v47 }
 0x2f5   : > { %1839 = vadd.xlane.f32.xlu0 %v1838_v49  ;;  %v1878_v26 = vpack.c.bf16 %v2608_v25, %v2604_v24  ;;  %v1841_v48 = vsel %vm732_vm0, %v2608_v25, 0.0 }
 0x2f6   : > { %2617 = vpow2.f32 %v1789_v19  ;;  %v1793_v30 = vmul.f32 1.442695, %v1735_v43  ;;  %v1795_v29 = vmul.f32 1.442695, %v1736_v44  ;;  %v1842_v35 = vadd.f32 %v2606_v10, %v1841_v48 }
 0x2f7   : > { %2619 = vpow2.f32 %v1791_v32  ;;  %2333 = vmatprep.mubr.msk.bf16.mxu1 %vm732_vm0, %v1878_v26 }
 0x2f8   : > { %v2610_v38 = vpop.eup %2609  ;;  %2621 = vpow2.f32 %v1793_v30  ;;  %1843 = vadd.xlane.f32.xlu1 %v1842_v35 }
 0x2f9   : > { %v2612_v36 = vpop.eup %2611  ;;  %2623 = vpow2.f32 %v1795_v29  ;;  %1974 = vmatmul.mubr.bf16.gmra.mrb[52].mxu1 %v1877_v45  ;;  %v1704_v50 = vpop.xlane.xlu0 %1703 }
 0x2fa   : > { %v2614_v31 = vpop.eup %2613  ;;  %v1737_v52 = vsub.f32 %v3625_v54, %v1704_v50  ;;  %v1738_v57 = vsub.f32 %v3622_v12, %v1704_v50  ;;  %v1845_v28 = vsel %vm732_vm0, %v2612_v36, 0.0 }
 0x2fb   : > { %v2616_v55 = vpop.eup %2615  ;;  %v1708_v56 = vpop.xlane.xlu1 %1707  ;;  %v1846_v4 = vadd.f32 %v2610_v38, %v1845_v28  ;;  %v1879_v12 = vpack.c.bf16 %v2614_v31, %v2610_v38 }
 0x2fc   : > { %v1797_v8 = vmul.f32 1.442695, %v1737_v52  ;;  %v1799_v21 = vmul.f32 1.442695, %v1738_v57  ;;  %v1739_v33 = vsub.f32 %v3633_v46, %v1708_v56  ;;  %v1740_v63 = vsub.f32 %v3628_v6, %v1708_v56 }
 0x2fd   : > { %1847 = vadd.xlane.f32.xlu0 %v1846_v4  ;;  %v1880_v11 = vpack.c.bf16 %v2616_v55, %v2612_v36  ;;  %v1849_v0 = vsel %vm732_vm0, %v2616_v55, 0.0 }
 0x2fe   : > { %2625 = vpow2.f32 %v1797_v8  ;;  %v1801_v1 = vmul.f32 1.442695, %v1739_v33  ;;  %v1803_v54 = vmul.f32 1.442695, %v1740_v63  ;;  %v1850_v53 = vadd.f32 %v2614_v31, %v1849_v0 }
 0x2ff   : > { %2627 = vpow2.f32 %v1799_v21  ;;  %2334 = vmatprep.mubr.msk.bf16.mxu1 %vm732_vm0, %v1880_v11 }
 0x300   : > { %v2618_v16 = vpop.eup %2617  ;;  %2629 = vpow2.f32 %v1801_v1  ;;  %1851 = vadd.xlane.f32.xlu1 %v1850_v53 }
 0x301   : > { %v2620_v41 = vpop.eup %2619  ;;  %2631 = vpow2.f32 %v1803_v54  ;;  %1982 = vmatmul.mubr.bf16.gmra.mrb[56].mxu1 %v1879_v12 }
 0x302   : > { %v2622_v46 = vpop.eup %2621  ;;  %v1853_v6 = vsel %vm732_vm0, %v2620_v41, 0.0 }
 0x303   : > { %v2624_v13 = vpop.eup %2623  ;;  %v1854_v60 = vadd.f32 %v2618_v16, %v1853_v6  ;;  %v1881_v9 = vpack.c.bf16 %v2622_v46, %v2618_v16 }
 0x304   : > { %v1882_v39 = vpack.c.bf16 %v2624_v13, %v2620_v41  ;;  %v1857_v37 = vsel %vm732_vm0, %v2624_v13, 0.0 }
 0x305   : > { %1855 = vadd.xlane.f32.xlu0 %v1854_v60  ;;  %v1858_v58 = vadd.f32 %v2622_v46, %v1857_v37 }
 0x306   : > { %2335 = vmatprep.mubr.msk.bf16.mxu1 %vm732_vm0, %v1882_v39 }
 0x307   : > { %1859 = vadd.xlane.f32.xlu1 %v1858_v58 }
 0x308   : > { %v2626_v3 = vpop.eup %2625 }
 0x309   : > { %v2628_v7 = vpop.eup %2627  ;;  %1990 = vmatmul.mubr.bf16.gmra.mrb[60].mxu1 %v1881_v9 }
 0x30a   : > { %v2630_v2 = vpop.eup %2629  ;;  %v1861_v18 = vsel %vm732_vm0, %v2628_v7, 0.0 }
 0x30b   : > { %v2632_v62 = vpop.eup %2631  ;;  %v1862_v14 = vadd.f32 %v2626_v3, %v1861_v18  ;;  %v1883_v59 = vpack.c.bf16 %v2630_v2, %v2626_v3 }
 0x30c   : > { %v1884_v42 = vpack.c.bf16 %v2632_v62, %v2628_v7  ;;  %v1865_v40 = vsel %vm732_vm0, %v2632_v62, 0.0 }
 0x30d   : > { %1863 = vadd.xlane.f32.xlu0 %v1862_v14  ;;  %v1866_v5 = vadd.f32 %v2630_v2, %v1865_v40 }
 0x30e   : > { %2336 = vmatprep.mubr.msk.bf16.mxu1 %vm732_vm0, %v1884_v42 }
 0x30f   : > { %1867 = vadd.xlane.f32.xlu1 %v1866_v5 }
 0x311   : > { %1998 = vmatmul.mubr.bf16.gmra.mrb[64].mxu1 %v1883_v59 }
 0x362   : > { %v1808_v34 = vpop.xlane.xlu0 %1807 }
 0x363   : > { %2633 = vrcp.f32 %v1808_v34 }
 0x367   : > { %v1812_v23 = vpop.xlane.xlu1 %1811 }
 0x368   : > { %2635 = vrcp.f32 %v1812_v23 }
 0x36a   : > { %v1816_v61 = vpop.xlane.xlu0 %1815 }
 0x36b   : > { %2637 = vrcp.f32 %v1816_v61 }
 0x36d   : > { %v2634_v17 = vpop.eup %2633 }
 0x36f   : > { %v1820_v15 = vpop.xlane.xlu1 %1819 }
 0x370   : > { %2639 = vrcp.f32 %v1820_v15 }
 0x372   : > { %v2636_v51 = vpop.eup %2635  ;;  %v1824_v20 = vpop.xlane.xlu0 %1823 }
 0x373   : > { %2641 = vrcp.f32 %v1824_v20 }
 0x375   : > { %v1828_v49 = vpop.xlane.xlu1 %1827  ;;  %v2638_v19 = vpop.eup %2637 }
 0x376   : > { %2643 = vrcp.f32 %v1828_v49 }
 0x37a   : > { %v2640_v26 = vpop.eup %2639  ;;  %v1832_v30 = vpop.xlane.xlu0 %1831 }
 0x37b   : > { %2645 = vrcp.f32 %v1832_v30 }
 0x37d   : > { %v1836_v45 = vpop.xlane.xlu1 %1835  ;;  %v2642_v38 = vpop.eup %2641 }
 0x37e   : > { %2647 = vrcp.f32 %v1836_v45 }
 0x380   : > { %v2644_v52 = vpop.eup %2643 }
 0x382   : > { %v1840_v28 = vpop.xlane.xlu0 %1839 }
 0x383   : > { %2649 = vrcp.f32 %v1840_v28 }
 0x385   : > { %v1844_v4 = vpop.xlane.xlu1 %1843  ;;  %v2646_v8 = vpop.eup %2645 }
 0x386   : > { %2651 = vrcp.f32 %v1844_v4 }
 0x388   : > { %v2648_v11 = vpop.eup %2647 }
 0x38a   : > { %v1848_v1 = vpop.xlane.xlu0 %1847 }
 0x38b   : > { %2653 = vrcp.f32 %v1848_v1 }
 0x38d   : > { %v1852_v12 = vpop.xlane.xlu1 %1851  ;;  %v2650_v16 = vpop.eup %2649 }
 0x38e   : > { %2655 = vrcp.f32 %v1852_v12 }
 0x390   : > { %v2652_v13 = vpop.eup %2651 }
 0x392   : > { %v1856_v39 = vpop.xlane.xlu0 %1855 }
 0x393   : > { %2657 = vrcp.f32 %v1856_v39 }
 0x394   : > { %v1860_v9 = vpop.xlane.xlu1 %1859 }
 0x395   : > { %v2654_v3 = vpop.eup %2653  ;;  %2659 = vrcp.f32 %v1860_v9 }
 0x398   : > { %v2656_v62 = vpop.eup %2655 }
 0x39a   : > { %v1864_v42 = vpop.xlane.xlu0 %1863 }
 0x39b   : > { %2661 = vrcp.f32 %v1864_v42 }
 0x39c   : > { %v1868_v59 = vpop.xlane.xlu1 %1867 }
 0x39d   : > { %v2658_v34 = vpop.eup %2657  ;;  %2663 = vrcp.f32 %v1868_v59 }
 0x3ac   : > { %v1943_v24 = vpop.f32.mrb[36].mxu1 }
 0x3ad   : > { %v2022_v27 = vmul.f32 %v2634_v17, %v1943_v24  ;;  %v1945_v10 = vpop.f32.mrb[37].mxu1  ;;  %v2660_v17 = vpop.eup %2659 }
 0x3ae   : > { %v1946_v22 = vpop.f32.mrb[38].mxu1 }
 0x3af   : > { %2038 = vst.msk [vmem:[%s3699_s29] sm:$0xff] %vm732_vm0, %v2022_v27  ;;  %v2023_v25 = vmul.f32 %v2636_v51, %v1946_v22  ;;  %v1948_v47 = vpop.f32.mrb[39].mxu1  ;;  %v2662_v51 = vpop.eup %2661 }
 0x3b0   : > { %v2664_v47 = vpop.eup %2663 }
 0x3b1   : > { %2039 = vst.msk [vmem:[%s3699_s29 + $0x8] sm:$0xff] %vm732_vm0, %v2023_v25 }
 0x3b4   : > { %v1951_v32 = vpop.f32.mrb[40].mxu1 }
 0x3b5   : > { %v2024_v43 = vmul.f32 %v2638_v19, %v1951_v32  ;;  %v1953_v44 = vpop.f32.mrb[41].mxu1 }
 0x3b6   : > { %v1954_v48 = vpop.f32.mrb[42].mxu1 }
 0x3b7   : > { %2040 = vst.msk [vmem:[%s3699_s29 + $0x10] sm:$0xff] %vm732_vm0, %v2024_v43  ;;  %v2025_v29 = vmul.f32 %v2640_v26, %v1954_v48  ;;  %v1956_v35 = vpop.f32.mrb[43].mxu1 }
 0x3b9   : > { %2041 = vst.msk [vmem:[%s3699_s29 + $0x18] sm:$0xff] %vm732_vm0, %v2025_v29 }
 0x3bc   : > { %v1959_v36 = vpop.f32.mrb[44].mxu1 }
 0x3bd   : > { %v2026_v50 = vmul.f32 %v2642_v38, %v1959_v36  ;;  %v1961_v31 = vpop.f32.mrb[45].mxu1 }
 0x3be   : > { %v1962_v57 = vpop.f32.mrb[46].mxu1 }
 0x3bf   : > { %2042 = vst.msk [vmem:[%s3699_s29 + $0x20] sm:$0xff] %vm732_vm0, %v2026_v50  ;;  %v2027_v55 = vmul.f32 %v2644_v52, %v1962_v57  ;;  %v1964_v56 = vpop.f32.mrb[47].mxu1 }
 0x3c1   : > { %2043 = vst.msk [vmem:[%s3699_s29 + $0x28] sm:$0xff] %vm732_vm0, %v2027_v55 }
 0x3c4   : > { %v1967_v21 = vpop.f32.mrb[48].mxu1 }
 0x3c5   : > { %v2028_v33 = vmul.f32 %v2646_v8, %v1967_v21  ;;  %v1969_v63 = vpop.f32.mrb[49].mxu1 }
 0x3c6   : > { %v1970_v0 = vpop.f32.mrb[50].mxu1 }
 0x3c7   : > { %2044 = vst.msk [vmem:[%s3699_s29 + $0x30] sm:$0xff] %vm732_vm0, %v2028_v33  ;;  %v2029_v54 = vmul.f32 %v2648_v11, %v1970_v0  ;;  %v1972_v53 = vpop.f32.mrb[51].mxu1 }
 0x3c9   : > { %2045 = vst.msk [vmem:[%s3699_s29 + $0x38] sm:$0xff] %vm732_vm0, %v2029_v54 }
 0x3cc   : > { %v1975_v41 = vpop.f32.mrb[52].mxu1 }
 0x3cd   : > { %v2030_v46 = vmul.f32 %v2650_v16, %v1975_v41  ;;  %v1977_v6 = vpop.f32.mrb[53].mxu1 }
 0x3ce   : > { %v1978_v60 = vpop.f32.mrb[54].mxu1 }
 0x3cf   : > { %2046 = vst.msk [vmem:[%s3699_s29 + $0x40] sm:$0xff] %vm732_vm0, %v2030_v46  ;;  %v2031_v37 = vmul.f32 %v2652_v13, %v1978_v60  ;;  %v1980_v58 = vpop.f32.mrb[55].mxu1 }
 0x3d1   : > { %2047 = vst.msk [vmem:[%s3699_s29 + $0x48] sm:$0xff] %vm732_vm0, %v2031_v37 }
 0x3d4   : > { %v1983_v7 = vpop.f32.mrb[56].mxu1 }
 0x3d5   : > { %v2032_v2 = vmul.f32 %v2654_v3, %v1983_v7  ;;  %v1985_v18 = vpop.f32.mrb[57].mxu1 }
 0x3d6   : > { %v1986_v14 = vpop.f32.mrb[58].mxu1 }
 0x3d7   : > { %2048 = vst.msk [vmem:[%s3699_s29 + $0x50] sm:$0xff] %vm732_vm0, %v2032_v2  ;;  %v2033_v40 = vmul.f32 %v2656_v62, %v1986_v14  ;;  %v1988_v5 = vpop.f32.mrb[59].mxu1 }
 0x3d9   : > { %2049 = vst.msk [vmem:[%s3699_s29 + $0x58] sm:$0xff] %vm732_vm0, %v2033_v40 }
 0x3dc   : > { %v1991_v23 = vpop.f32.mrb[60].mxu1 }
 0x3dd   : > { %v2034_v61 = vmul.f32 %v2658_v34, %v1991_v23  ;;  %v1993_v15 = vpop.f32.mrb[61].mxu1 }
 0x3de   : > { %v1994_v24 = vpop.f32.mrb[62].mxu1 }
 0x3df   : > { %2050 = vst.msk [vmem:[%s3699_s29 + $0x60] sm:$0xff] %vm732_vm0, %v2034_v61  ;;  %v2035_v27 = vmul.f32 %v2660_v17, %v1994_v24  ;;  %v1996_v10 = vpop.f32.mrb[63].mxu1 }
 0x3e1   : > { %2051 = vst.msk [vmem:[%s3699_s29 + $0x68] sm:$0xff] %vm732_vm0, %v2035_v27 }
 0x3e4   : > { %v1999_v22 = vpop.f32.mrb[64].mxu1 }
 0x3e5   : > { %v2036_v20 = vmul.f32 %v2662_v51, %v1999_v22  ;;  %v2001_v25 = vpop.f32.mrb[65].mxu1 }
 0x3e6   : > { %v2002_v49 = vpop.f32.mrb[66].mxu1 }
 0x3e7   : > { %2052 = vst.msk [vmem:[%s3699_s29 + $0x70] sm:$0xff] %vm732_vm0, %v2036_v20  ;;  %v2037_v19 = vmul.f32 %v2664_v47, %v2002_v49  ;;  %v2004_v32 = vpop.f32.mrb[67].mxu1 }
 0x3e9   : > { %2053 = vst.msk [vmem:[%s3699_s29 + $0x78] sm:$0xff] %vm732_vm0, %v2037_v19 }
 0x3ea PF: > { %s22_s23 = sadd.s32 1, %s2687_s23   ;;  %s3756_s21 = smov %s2683_s22 }
 0x3eb   : > { %p19_p5 = scmp.ge.s32.totalorder %s22_s23, 6   ;;  %s3757_s22 = smov %s3759_s24 }
 0x3ed   :  { %21 = sbr.rel (!%p19_p5) target bundleno = 2 (0x2), region = 110 }

</bundles_post_ra>
